<compile_context>
chip_gen: v5e
topology: v5e:2x2
jax: 0.10.0
libtpu: 0.0.40
codegen_flags: <defaults>
</compile_context>

<pallas_src>
import functools

import numpy as np
import jax
import jax.numpy as jnp
from jax.experimental import pallas as pl
from jax.experimental.pallas import tpu as pltpu

EPS = 1e-5


# ----------------------------------------------------------------------------
# Fused Pallas kernel (bt batch elements per grid step)
# ----------------------------------------------------------------------------
def _skip_kernel(x_ref, w1, w2, w3, w4, wres, b1, b2, b3, b4, bres,
                 o_ref, pin, pa, pb, stage, *,
                 BT, H, W, Cin, Cout, OFF, dilations):
    """Fused SkipConnection01 forward for BT batch elements.

    x_ref : (BT, H, W*Cin)          input, lane-dense (W,C flattened on lanes)
    w{k}  : (3*W*Cin_k, W*Cout)     banded dy-tap weights (K-concat), BN folded
    wres  : (W*Cin, W*Cout)         block-diagonal 1x1 weights, BN folded
    b*    : (1, W*Cout)             fused conv-bias + BN bias, tiled over W
    o_ref : (BT, H, W*Cout)
    pin   : (BT, H+2*OFF, W*Cin)    zero-halo padded input     (VMEM scratch)
    pa/pb : (BT, H+2*OFF, W*Cout)   ping/pong activations      (VMEM scratch)
    stage : (BT*H, 3*max(WCi,WCo))  K-concat matmul staging    (VMEM scratch)
    """
    WCi, WCo = W * Cin, W * Cout
    M = BT * H

    # Zero only the 8-row-aligned halo blocks; the interiors are always fully
    # overwritten below, so the halos stay zero for every layer.  Do NOT gate
    # this with program_id==0: under dimension_semantics=("parallel",) the
    # second v7x TensorCore never executes step 0.
    for buf in (pin, pa, pb):
        z = jnp.zeros((BT, OFF, buf.shape[-1]), jnp.float32)
        buf[:, :OFF, :] = z
        buf[:, OFF + H:, :] = z

    pin[:, OFF:OFF + H, :] = x_ref[...]

    def conv3x3(src, w_ref, b_ref, d):
        cin_l = src.shape[-1]
        # Stage the three dy-shifted row windows side-by-side along K so the
        # whole layer is a single MXU matmul (no per-tap accumulator adds).
        for t, dy in enumerate((-d, 0, d)):
            stage[:, t * cin_l:(t + 1) * cin_l] = (
                src[:, OFF + dy:OFF + dy + H, :].reshape(M, cin_l))
        y = jnp.dot(stage[:, :3 * cin_l], w_ref[...],
                    preferred_element_type=jnp.float32)
        return jnp.maximum(y + b_ref[...], 0.0)            # bias + ReLU (f32)

    y = conv3x3(pin, w1, b1, dilations[0])
    pa[:, OFF:OFF + H, :] = y.reshape(BT, H, WCo)
    y = conv3x3(pa, w2, b2, dilations[1])
    pb[:, OFF:OFF + H, :] = y.reshape(BT, H, WCo)
    y = conv3x3(pb, w3, b3, dilations[2])
    pa[:, OFF:OFF + H, :] = y.reshape(BT, H, WCo)
    y4 = conv3x3(pa, w4, b4, dilations[3])   # layer 4: fused with residual add

    # 1x1 residual branch (single lane-dense MXU matmul) + ReLU, fused into
    # the final add so the layer-4 activation never round-trips through VMEM.
    xr = x_ref[...].reshape(M, WCi)
    r = jnp.dot(xr, wres[...], preferred_element_type=jnp.float32)
    r = jnp.maximum(r + bres[...], 0.0)
    o_ref[...] = (y4 + r).reshape(BT, H, WCo)


# ----------------------------------------------------------------------------
# pallas_call wrapper
# ----------------------------------------------------------------------------
def skip_connection01_pallas(x_nchw, bp, *, bt=None):
    B, Cin, H, W = x_nchw.shape
    Cout = bp["cout"]
    dil = bp["dilations"]
    OFF = 8                       # 8-sublane-aligned halo (>= max dilation 3)
    Hp = H + 2 * OFF
    WCi, WCo = W * Cin, W * Cout

    if bt is None:
        # Batch-block to raise matmul M on the 256-wide v6e/v7x MXU, but keep
        # >= 2 grid steps so both v7x TensorCores get work.  B=2 -> bt=1.
        bt = 1
        for cand in (8, 4, 2):
            if B % cand == 0 and B // cand >= 2:
                bt = cand
                break
    assert B % bt == 0

    # NCHW -> (B, H, W*C) lane-dense layout.  NOTE: in a real network keep
    # activations in this layout across adjacent fused blocks so these two
    # HBM transpose passes (which can cost as much as the kernel) disappear.
    x = jnp.transpose(x_nchw, (0, 2, 3, 1)).reshape(B, H, WCi)

    kernel = functools.partial(_skip_kernel, BT=bt, H=H, W=W, Cin=Cin,
                               Cout=Cout, OFF=OFF, dilations=dil)

    def _full(shape):
        # Constant weight/bias blocks (index never changes across the grid).
        # pipeline_mode=pl.Buffered(1) would halve their VMEM footprint; left
        # default here since it is negligible at these shapes.
        return pl.BlockSpec(shape, lambda b: (0,) * len(shape))

    in_specs = ([pl.BlockSpec((bt, H, WCi), lambda b: (b, 0, 0))]
                + [_full(w.shape) for w in bp["w_stack"]]
                + [_full(bp["w_res"].shape)]
                + [_full(b.shape) for b in bp["b_stack"]]
                + [_full(bp["b_res"].shape)])

    kmax = 3 * max(WCi, WCo)
    out = pl.pallas_call(
        kernel,
        out_shape=jax.ShapeDtypeStruct((B, H, WCo), jnp.float32),
        grid_spec=pltpu.PrefetchScalarGridSpec(
            num_scalar_prefetch=0,
            grid=(B // bt,),
            in_specs=in_specs,
            out_specs=pl.BlockSpec((bt, H, WCo), lambda b: (b, 0, 0)),
            scratch_shapes=[
                pltpu.VMEM((bt, Hp, WCi), jnp.float32),    # padded input
                pltpu.VMEM((bt, Hp, WCo), jnp.float32),    # ping activation
                pltpu.VMEM((bt, Hp, WCo), jnp.float32),    # pong activation
                pltpu.VMEM((bt * H, kmax), jnp.float32),   # K-concat staging
            ]),
        compiler_params=pltpu.CompilerParams(
            dimension_semantics=("parallel",)),     # v7x: 2 TCs split batch
    )(x, *bp["w_stack"], bp["w_res"], *bp["b_stack"], bp["b_res"])

    # (B, H, W*Cout) -> NCHW (boundary glue to match the PyTorch interface).
    return jnp.transpose(out.reshape(B, H, W, Cout), (0, 3, 1, 2))


# ----------------------------------------------------------------------------
# Parameter construction + offline weight preprocessing
# ----------------------------------------------------------------------------
def _fused_bn(conv_bias, gamma, beta, running_mean, running_var):
    s = gamma / jnp.sqrt(running_var + EPS)
    scale = s.astype(jnp.float32)
    bias = ((conv_bias - running_mean) * s + beta).astype(jnp.float32)
    return scale, bias


def make_params(key, cin, cout):
    """Params for: 4x (conv3x3 + BN + ReLU) stack and the 1x1 residual."""
    dilations = (1, 1, 2, 3)
    stack = []
    c_in = cin
    for d in dilations:
        key, k1, k2, k3, k4, k5, k6 = jax.random.split(key, 7)
        w = jax.random.normal(k1, (3, 3, c_in, cout), jnp.float32) * 0.1
        b = jax.random.normal(k2, (cout,), jnp.float32) * 0.05
        gamma = 1.0 + 0.1 * jax.random.normal(k3, (cout,), jnp.float32)
        beta = 0.1 * jax.random.normal(k4, (cout,), jnp.float32)
        mean = 0.05 * jax.random.normal(k5, (cout,), jnp.float32)
        var = 1.0 + 0.1 * jax.random.uniform(k6, (cout,), jnp.float32)
        scale, bias = _fused_bn(b, gamma, beta, mean, var)
        stack.append(dict(w=w, scale=scale, bias=bias, dilation=d))
        c_in = cout
    key, k1, k2, k3, k4, k5, k6 = jax.random.split(key, 7)
    w = jax.random.normal(k1, (1, 1, cin, cout), jnp.float32) * 0.1
    b = jax.random.normal(k2, (cout,), jnp.float32) * 0.05
    gamma = 1.0 + 0.1 * jax.random.normal(k3, (cout,), jnp.float32)
    beta = 0.1 * jax.random.normal(k4, (cout,), jnp.float32)
    mean = 0.05 * jax.random.normal(k5, (cout,), jnp.float32)
    var = 1.0 + 0.1 * jax.random.uniform(k6, (cout,), jnp.float32)
    scale, bias = _fused_bn(b, gamma, beta, mean, var)
    res = dict(w=w, scale=scale, bias=bias)
    return dict(stack=stack, res=res, dilations=dilations, cout=cout)


def prepare_pallas_params(params, W):
    """Fold BN scale into weights and build lane-dense banded matrices.

    In the (B, H, W*C) layout a dilated 3x3 conv's dx taps and its zero 'same'
    padding along W are encoded in a banded (W*Cin, W*Cout) matrix per dy tap.
    The three dy taps are concatenated along K into one (3*W*Cin, W*Cout)
    matrix so the kernel runs a single matmul per layer.  The 1x1 residual
    becomes a block-diagonal (W*Cin, W*Cout) matmul.  Done once, offline.

    NOTE: only 1/W of each banded matrix is nonzero (weight bytes and MXU
    FLOPs inflated W-fold).  Fine at W=16; beyond W~64 switch to per-tap
    (Cin,Cout) matmuls on an (H*W, Cin) layout or tile W, and set
    vmem_limit_bytes explicitly.
    """
    w_stack, b_stack = [], []
    for layer in params["stack"]:
        w = layer["w"] * layer["scale"].reshape(1, 1, 1, -1)   # fold BN scale
        d = layer["dilation"]
        cin, cout = w.shape[2], w.shape[3]
        mask = np.zeros((3, W, W), np.float32)                 # (kx, xin, x)
        for kx in range(3):
            for x in range(W):
                xin = x + (kx - 1) * d
                if 0 <= xin < W:
                    mask[kx, xin, x] = 1.0
        wb = jnp.einsum("kix,ykab->yiaxb", jnp.asarray(mask), w)
        # (ky, W*cin, W*cout) -> K-concat (3*W*cin, W*cout); ky order matches
        # the kernel's staging order (dy = -d, 0, +d).
        w_stack.append(wb.reshape(3 * W * cin, W * cout))
        b_stack.append(jnp.tile(layer["bias"], W).reshape(1, W * cout))
    res = params["res"]
    cin, cout = res["w"].shape[2], res["w"].shape[3]
    wr = res["w"].reshape(cin, cout) * res["scale"].reshape(1, -1)
    w_res = jnp.einsum("ix,ab->iaxb", jnp.eye(W, dtype=jnp.float32),
                       wr).reshape(W * cin, W * cout)
    b_res = jnp.tile(res["bias"], W).reshape(1, W * cout)
    return dict(w_stack=w_stack, b_stack=b_stack, w_res=w_res, b_res=b_res,
                cout=params["cout"], dilations=params["dilations"])


# ----------------------------------------------------------------------------
# Pure-JAX reference (lax.conv), BN in eval mode
# ----------------------------------------------------------------------------
def skip_connection01_reference(x_nchw, params):
    dn = ("NHWC", "HWIO", "NHWC")
    x = jnp.transpose(x_nchw, (0, 2, 3, 1))
    h = x
    for layer in params["stack"]:
        d = layer["dilation"]
        y = jax.lax.conv_general_dilated(
            h, layer["w"], window_strides=(1, 1),
            padding=((d, d), (d, d)), rhs_dilation=(d, d),
            dimension_numbers=dn)
        h = jnp.maximum(y * layer["scale"].reshape(1, 1, 1, -1)
                        + layer["bias"].reshape(1, 1, 1, -1), 0.0)
    res = params["res"]
    y = jax.lax.conv_general_dilated(
        x, res["w"], window_strides=(1, 1), padding=((0, 0), (0, 0)),
        dimension_numbers=dn)
    r = jnp.maximum(y * res["scale"].reshape(1, 1, 1, -1)
                    + res["bias"].reshape(1, 1, 1, -1), 0.0)
    return jnp.transpose(h + r, (0, 3, 1, 2))


if __name__ == "__main__":
    # TODO(synk): BatchNorm is folded with inference (eval) semantics; training
    # mode batch-stat updates are not modelled.
    B, Cin, Cout, H, W = 2, 4, 8, 16, 16
    key = jax.random.PRNGKey(0)
    key, kx, kp = jax.random.split(key, 3)
    x = jax.random.normal(kx, (B, Cin, H, W), jnp.float32)
    params = make_params(kp, Cin, Cout)
    banded = prepare_pallas_params(params, W)

    out = jax.block_until_ready(skip_connection01_pallas(x, banded))
    ref = jax.block_until_ready(skip_connection01_reference(x, params))

    assert out.shape == (B, Cout, H, W), out.shape
    err = float(jnp.max(jnp.abs(out - ref)))
    if err > 1e-4:
        raise AssertionError(f"Pallas kernel mismatch vs reference: {err}")
    print("KERNEL_OK")
</pallas_src>

<mosaic_0001>
module attributes {stable_mosaic.version = 11 : i64} {
  func.func @_skip_kernel(%arg0: i32, %arg1: memref<1x16x64xf32, #tpu.memory_space<vmem>>, %arg2: memref<192x128xf32, #tpu.memory_space<vmem>>, %arg3: memref<384x128xf32, #tpu.memory_space<vmem>>, %arg4: memref<384x128xf32, #tpu.memory_space<vmem>>, %arg5: memref<384x128xf32, #tpu.memory_space<vmem>>, %arg6: memref<64x128xf32, #tpu.memory_space<vmem>>, %arg7: memref<1x128xf32, #tpu.memory_space<vmem>>, %arg8: memref<1x128xf32, #tpu.memory_space<vmem>>, %arg9: memref<1x128xf32, #tpu.memory_space<vmem>>, %arg10: memref<1x128xf32, #tpu.memory_space<vmem>>, %arg11: memref<1x128xf32, #tpu.memory_space<vmem>>, %arg12: memref<1x16x128xf32, #tpu.memory_space<vmem>>, %arg13: memref<1x32x64xf32, #tpu.memory_space<vmem>>, %arg14: memref<1x32x128xf32, #tpu.memory_space<vmem>>, %arg15: memref<1x32x128xf32, #tpu.memory_space<vmem>>, %arg16: memref<16x384xf32, #tpu.memory_space<vmem>>) attributes {dimension_semantics = [#tpu.dimension_semantics<parallel>], iteration_bounds = array<i64: 2>, scalar_prefetch = 0 : i64, scratch_operands = 4 : i64, tpu.core_type = #tpu.core_type<tc>, window_params = [{transform_indices = @transform_0, window_bounds = array<i64: 1, 16, 64>}, {pipeline_mode = #tpu.pipeline_mode<synchronous>, transform_indices = @transform_1, window_bounds = array<i64: 192, 128>}, {pipeline_mode = #tpu.pipeline_mode<synchronous>, transform_indices = @transform_2, window_bounds = array<i64: 384, 128>}, {pipeline_mode = #tpu.pipeline_mode<synchronous>, transform_indices = @transform_3, window_bounds = array<i64: 384, 128>}, {pipeline_mode = #tpu.pipeline_mode<synchronous>, transform_indices = @transform_4, window_bounds = array<i64: 384, 128>}, {pipeline_mode = #tpu.pipeline_mode<synchronous>, transform_indices = @transform_5, window_bounds = array<i64: 64, 128>}, {pipeline_mode = #tpu.pipeline_mode<synchronous>, transform_indices = @transform_6, window_bounds = array<i64: 1, 128>}, {pipeline_mode = #tpu.pipeline_mode<synchronous>, transform_indices = @transform_7, window_bounds = array<i64: 1, 128>}, {pipeline_mode = #tpu.pipeline_mode<synchronous>, transform_indices = @transform_8, window_bounds = array<i64: 1, 128>}, {pipeline_mode = #tpu.pipeline_mode<synchronous>, transform_indices = @transform_9, window_bounds = array<i64: 1, 128>}, {pipeline_mode = #tpu.pipeline_mode<synchronous>, transform_indices = @transform_10, window_bounds = array<i64: 1, 128>}, {transform_indices = @transform_11, window_bounds = array<i64: 1, 16, 128>}]} {
    %cst = arith.constant 0.000000e+00 : f32
    %0 = vector.broadcast %cst : f32 to vector<1x8x64xf32>
    %c0 = arith.constant 0 : index
    %c0_0 = arith.constant 0 : index
    %c0_1 = arith.constant 0 : index
    %1 = vector.load %arg13[%c0, %c0_0, %c0_1] : memref<1x32x64xf32, #tpu.memory_space<vmem>>, vector<1x8x64xf32>
    tpu.vector_store %arg13[%c0, %c0_0, %c0_1], %0 {strides = array<i32>} : memref<1x32x64xf32, #tpu.memory_space<vmem>>, vector<1x8x64xf32>,
    %c0_2 = arith.constant 0 : index
    %c24 = arith.constant 24 : index
    %c0_3 = arith.constant 0 : index
    %2 = vector.load %arg13[%c0_2, %c24, %c0_3] : memref<1x32x64xf32, #tpu.memory_space<vmem>>, vector<1x8x64xf32>
    tpu.vector_store %arg13[%c0_2, %c24, %c0_3], %0 {strides = array<i32>} : memref<1x32x64xf32, #tpu.memory_space<vmem>>, vector<1x8x64xf32>,
    %cst_4 = arith.constant 0.000000e+00 : f32
    %3 = vector.broadcast %cst_4 : f32 to vector<1x8x128xf32>
    %c0_5 = arith.constant 0 : index
    %c0_6 = arith.constant 0 : index
    %c0_7 = arith.constant 0 : index
    %4 = vector.load %arg14[%c0_5, %c0_6, %c0_7] : memref<1x32x128xf32, #tpu.memory_space<vmem>>, vector<1x8x128xf32>
    tpu.vector_store %arg14[%c0_5, %c0_6, %c0_7], %3 {strides = array<i32>} : memref<1x32x128xf32, #tpu.memory_space<vmem>>, vector<1x8x128xf32>,
    %c0_8 = arith.constant 0 : index
    %c24_9 = arith.constant 24 : index
    %c0_10 = arith.constant 0 : index
    %5 = vector.load %arg14[%c0_8, %c24_9, %c0_10] : memref<1x32x128xf32, #tpu.memory_space<vmem>>, vector<1x8x128xf32>
    tpu.vector_store %arg14[%c0_8, %c24_9, %c0_10], %3 {strides = array<i32>} : memref<1x32x128xf32, #tpu.memory_space<vmem>>, vector<1x8x128xf32>,
    %cst_11 = arith.constant 0.000000e+00 : f32
    %6 = vector.broadcast %cst_11 : f32 to vector<1x8x128xf32>
    %c0_12 = arith.constant 0 : index
    %c0_13 = arith.constant 0 : index
    %c0_14 = arith.constant 0 : index
    %7 = vector.load %arg15[%c0_12, %c0_13, %c0_14] : memref<1x32x128xf32, #tpu.memory_space<vmem>>, vector<1x8x128xf32>
    tpu.vector_store %arg15[%c0_12, %c0_13, %c0_14], %6 {strides = array<i32>} : memref<1x32x128xf32, #tpu.memory_space<vmem>>, vector<1x8x128xf32>,
    %c0_15 = arith.constant 0 : index
    %c24_16 = arith.constant 24 : index
    %c0_17 = arith.constant 0 : index
    %8 = vector.load %arg15[%c0_15, %c24_16, %c0_17] : memref<1x32x128xf32, #tpu.memory_space<vmem>>, vector<1x8x128xf32>
    tpu.vector_store %arg15[%c0_15, %c24_16, %c0_17], %6 {strides = array<i32>} : memref<1x32x128xf32, #tpu.memory_space<vmem>>, vector<1x8x128xf32>,
    %c0_18 = arith.constant 0 : index
    %c0_19 = arith.constant 0 : index
    %c0_20 = arith.constant 0 : index
    %9 = vector.load %arg1[%c0_18, %c0_19, %c0_20] : memref<1x16x64xf32, #tpu.memory_space<vmem>>, vector<1x16x64xf32>
    %c0_21 = arith.constant 0 : index
    %c8 = arith.constant 8 : index
    %c0_22 = arith.constant 0 : index
    %10 = vector.load %arg13[%c0_21, %c8, %c0_22] : memref<1x32x64xf32, #tpu.memory_space<vmem>>, vector<1x16x64xf32>
    tpu.vector_store %arg13[%c0_21, %c8, %c0_22], %9 {strides = array<i32>} : memref<1x32x64xf32, #tpu.memory_space<vmem>>, vector<1x16x64xf32>,
    %c0_23 = arith.constant 0 : index
    %c7 = arith.constant 7 : index
    %c0_24 = arith.constant 0 : index
    %11 = vector.load %arg13[%c0_23, %c7, %c0_24] : memref<1x32x64xf32, #tpu.memory_space<vmem>>, vector<1x16x64xf32>
    %12 = vector.shape_cast %11 : vector<1x16x64xf32> to vector<16x64xf32>
    %c0_25 = arith.constant 0 : index
    %c0_26 = arith.constant 0 : index
    %13 = vector.load %arg16[%c0_25, %c0_26] : memref<16x384xf32, #tpu.memory_space<vmem>>, vector<16x64xf32>
    tpu.vector_store %arg16[%c0_25, %c0_26], %12 {strides = array<i32>} : memref<16x384xf32, #tpu.memory_space<vmem>>, vector<16x64xf32>,
    %c0_27 = arith.constant 0 : index
    %c8_28 = arith.constant 8 : index
    %c0_29 = arith.constant 0 : index
    %14 = vector.load %arg13[%c0_27, %c8_28, %c0_29] : memref<1x32x64xf32, #tpu.memory_space<vmem>>, vector<1x16x64xf32>
    %15 = vector.shape_cast %14 : vector<1x16x64xf32> to vector<16x64xf32>
    %c0_30 = arith.constant 0 : index
    %c64 = arith.constant 64 : index
    %16 = vector.load %arg16[%c0_30, %c64] : memref<16x384xf32, #tpu.memory_space<vmem>>, vector<16x64xf32>
    tpu.vector_store %arg16[%c0_30, %c64], %15 {strides = array<i32>} : memref<16x384xf32, #tpu.memory_space<vmem>>, vector<16x64xf32>,
    %c0_31 = arith.constant 0 : index
    %c9 = arith.constant 9 : index
    %c0_32 = arith.constant 0 : index
    %17 = vector.load %arg13[%c0_31, %c9, %c0_32] : memref<1x32x64xf32, #tpu.memory_space<vmem>>, vector<1x16x64xf32>
    %18 = vector.shape_cast %17 : vector<1x16x64xf32> to vector<16x64xf32>
    %c0_33 = arith.constant 0 : index
    %c128 = arith.constant 128 : index
    %19 = vector.load %arg16[%c0_33, %c128] : memref<16x384xf32, #tpu.memory_space<vmem>>, vector<16x64xf32>
    tpu.vector_store %arg16[%c0_33, %c128], %18 {strides = array<i32>} : memref<16x384xf32, #tpu.memory_space<vmem>>, vector<16x64xf32>,
    %c0_34 = arith.constant 0 : index
    %c0_35 = arith.constant 0 : index
    %20 = vector.load %arg16[%c0_34, %c0_35] : memref<16x384xf32, #tpu.memory_space<vmem>>, vector<16x192xf32>
    %c0_36 = arith.constant 0 : index
    %c0_37 = arith.constant 0 : index
    %21 = vector.load %arg2[%c0_36, %c0_37] : memref<192x128xf32, #tpu.memory_space<vmem>>, vector<192x128xf32>
    %cst_38 = arith.constant dense<0.000000e+00> : vector<16x128xf32>
    %22 = tpu.matmul %20, %21, %cst_38 {dimension_numbers = #tpu.dot_dimension_numbers<[1], [0], [0], [1], [0, 0, 1, 1], [], []>} : vector<16x192xf32>, vector<192x128xf32>, vector<16x128xf32> -> vector<16x128xf32>
    %c0_39 = arith.constant 0 : index
    %c0_40 = arith.constant 0 : index
    %23 = vector.load %arg7[%c0_39, %c0_40] : memref<1x128xf32, #tpu.memory_space<vmem>>, vector<1x128xf32>
    %24 = vector.broadcast %23 : vector<1x128xf32> to vector<16x128xf32>
    %25 = arith.addf %22, %24 : vector<16x128xf32>
    %cst_41 = arith.constant 0.000000e+00 : f32
    %26 = vector.broadcast %cst_41 : f32 to vector<16x128xf32>
    %27 = arith.maximumf %25, %26 : vector<16x128xf32>
    %28 = vector.shape_cast %27 : vector<16x128xf32> to vector<1x16x128xf32>
    %c0_42 = arith.constant 0 : index
    %c8_43 = arith.constant 8 : index
    %c0_44 = arith.constant 0 : index
    %29 = vector.load %arg14[%c0_42, %c8_43, %c0_44] : memref<1x32x128xf32, #tpu.memory_space<vmem>>, vector<1x16x128xf32>
    tpu.vector_store %arg14[%c0_42, %c8_43, %c0_44], %28 {strides = array<i32>} : memref<1x32x128xf32, #tpu.memory_space<vmem>>, vector<1x16x128xf32>,
    %c0_45 = arith.constant 0 : index
    %c7_46 = arith.constant 7 : index
    %c0_47 = arith.constant 0 : index
    %30 = vector.load %arg14[%c0_45, %c7_46, %c0_47] : memref<1x32x128xf32, #tpu.memory_space<vmem>>, vector<1x16x128xf32>
    %31 = vector.shape_cast %30 : vector<1x16x128xf32> to vector<16x128xf32>
    %c0_48 = arith.constant 0 : index
    %c0_49 = arith.constant 0 : index
    %32 = vector.load %arg16[%c0_48, %c0_49] : memref<16x384xf32, #tpu.memory_space<vmem>>, vector<16x128xf32>
    tpu.vector_store %arg16[%c0_48, %c0_49], %31 {strides = array<i32>} : memref<16x384xf32, #tpu.memory_space<vmem>>, vector<16x128xf32>,
    %c0_50 = arith.constant 0 : index
    %c8_51 = arith.constant 8 : index
    %c0_52 = arith.constant 0 : index
    %33 = vector.load %arg14[%c0_50, %c8_51, %c0_52] : memref<1x32x128xf32, #tpu.memory_space<vmem>>, vector<1x16x128xf32>
    %34 = vector.shape_cast %33 : vector<1x16x128xf32> to vector<16x128xf32>
    %c0_53 = arith.constant 0 : index
    %c128_54 = arith.constant 128 : index
    %35 = vector.load %arg16[%c0_53, %c128_54] : memref<16x384xf32, #tpu.memory_space<vmem>>, vector<16x128xf32>
    tpu.vector_store %arg16[%c0_53, %c128_54], %34 {strides = array<i32>} : memref<16x384xf32, #tpu.memory_space<vmem>>, vector<16x128xf32>,
    %c0_55 = arith.constant 0 : index
    %c9_56 = arith.constant 9 : index
    %c0_57 = arith.constant 0 : index
    %36 = vector.load %arg14[%c0_55, %c9_56, %c0_57] : memref<1x32x128xf32, #tpu.memory_space<vmem>>, vector<1x16x128xf32>
    %37 = vector.shape_cast %36 : vector<1x16x128xf32> to vector<16x128xf32>
    %c0_58 = arith.constant 0 : index
    %c256 = arith.constant 256 : index
    %38 = vector.load %arg16[%c0_58, %c256] : memref<16x384xf32, #tpu.memory_space<vmem>>, vector<16x128xf32>
    tpu.vector_store %arg16[%c0_58, %c256], %37 {strides = array<i32>} : memref<16x384xf32, #tpu.memory_space<vmem>>, vector<16x128xf32>,
    %c0_59 = arith.constant 0 : index
    %c0_60 = arith.constant 0 : index
    %39 = vector.load %arg16[%c0_59, %c0_60] : memref<16x384xf32, #tpu.memory_space<vmem>>, vector<16x384xf32>
    %c0_61 = arith.constant 0 : index
    %c0_62 = arith.constant 0 : index
    %40 = vector.load %arg3[%c0_61, %c0_62] : memref<384x128xf32, #tpu.memory_space<vmem>>, vector<384x128xf32>
    %cst_63 = arith.constant dense<0.000000e+00> : vector<16x128xf32>
    %41 = tpu.matmul %39, %40, %cst_63 {dimension_numbers = #tpu.dot_dimension_numbers<[1], [0], [0], [1], [0, 0, 1, 1], [], []>} : vector<16x384xf32>, vector<384x128xf32>, vector<16x128xf32> -> vector<16x128xf32>
    %c0_64 = arith.constant 0 : index
    %c0_65 = arith.constant 0 : index
    %42 = vector.load %arg8[%c0_64, %c0_65] : memref<1x128xf32, #tpu.memory_space<vmem>>, vector<1x128xf32>
    %43 = vector.broadcast %42 : vector<1x128xf32> to vector<16x128xf32>
    %44 = arith.addf %41, %43 : vector<16x128xf32>
    %cst_66 = arith.constant 0.000000e+00 : f32
    %45 = vector.broadcast %cst_66 : f32 to vector<16x128xf32>
    %46 = arith.maximumf %44, %45 : vector<16x128xf32>
    %47 = vector.shape_cast %46 : vector<16x128xf32> to vector<1x16x128xf32>
    %c0_67 = arith.constant 0 : index
    %c8_68 = arith.constant 8 : index
    %c0_69 = arith.constant 0 : index
    %48 = vector.load %arg15[%c0_67, %c8_68, %c0_69] : memref<1x32x128xf32, #tpu.memory_space<vmem>>, vector<1x16x128xf32>
    tpu.vector_store %arg15[%c0_67, %c8_68, %c0_69], %47 {strides = array<i32>} : memref<1x32x128xf32, #tpu.memory_space<vmem>>, vector<1x16x128xf32>,
    %c0_70 = arith.constant 0 : index
    %c6 = arith.constant 6 : index
    %c0_71 = arith.constant 0 : index
    %49 = vector.load %arg15[%c0_70, %c6, %c0_71] : memref<1x32x128xf32, #tpu.memory_space<vmem>>, vector<1x16x128xf32>
    %50 = vector.shape_cast %49 : vector<1x16x128xf32> to vector<16x128xf32>
    %c0_72 = arith.constant 0 : index
    %c0_73 = arith.constant 0 : index
    %51 = vector.load %arg16[%c0_72, %c0_73] : memref<16x384xf32, #tpu.memory_space<vmem>>, vector<16x128xf32>
    tpu.vector_store %arg16[%c0_72, %c0_73], %50 {strides = array<i32>} : memref<16x384xf32, #tpu.memory_space<vmem>>, vector<16x128xf32>,
    %c0_74 = arith.constant 0 : index
    %c8_75 = arith.constant 8 : index
    %c0_76 = arith.constant 0 : index
    %52 = vector.load %arg15[%c0_74, %c8_75, %c0_76] : memref<1x32x128xf32, #tpu.memory_space<vmem>>, vector<1x16x128xf32>
    %53 = vector.shape_cast %52 : vector<1x16x128xf32> to vector<16x128xf32>
    %c0_77 = arith.constant 0 : index
    %c128_78 = arith.constant 128 : index
    %54 = vector.load %arg16[%c0_77, %c128_78] : memref<16x384xf32, #tpu.memory_space<vmem>>, vector<16x128xf32>
    tpu.vector_store %arg16[%c0_77, %c128_78], %53 {strides = array<i32>} : memref<16x384xf32, #tpu.memory_space<vmem>>, vector<16x128xf32>,
    %c0_79 = arith.constant 0 : index
    %c10 = arith.constant 10 : index
    %c0_80 = arith.constant 0 : index
    %55 = vector.load %arg15[%c0_79, %c10, %c0_80] : memref<1x32x128xf32, #tpu.memory_space<vmem>>, vector<1x16x128xf32>
    %56 = vector.shape_cast %55 : vector<1x16x128xf32> to vector<16x128xf32>
    %c0_81 = arith.constant 0 : index
    %c256_82 = arith.constant 256 : index
    %57 = vector.load %arg16[%c0_81, %c256_82] : memref<16x384xf32, #tpu.memory_space<vmem>>, vector<16x128xf32>
    tpu.vector_store %arg16[%c0_81, %c256_82], %56 {strides = array<i32>} : memref<16x384xf32, #tpu.memory_space<vmem>>, vector<16x128xf32>,
    %c0_83 = arith.constant 0 : index
    %c0_84 = arith.constant 0 : index
    %58 = vector.load %arg16[%c0_83, %c0_84] : memref<16x384xf32, #tpu.memory_space<vmem>>, vector<16x384xf32>
    %c0_85 = arith.constant 0 : index
    %c0_86 = arith.constant 0 : index
    %59 = vector.load %arg4[%c0_85, %c0_86] : memref<384x128xf32, #tpu.memory_space<vmem>>, vector<384x128xf32>
    %cst_87 = arith.constant dense<0.000000e+00> : vector<16x128xf32>
    %60 = tpu.matmul %58, %59, %cst_87 {dimension_numbers = #tpu.dot_dimension_numbers<[1], [0], [0], [1], [0, 0, 1, 1], [], []>} : vector<16x384xf32>, vector<384x128xf32>, vector<16x128xf32> -> vector<16x128xf32>
    %c0_88 = arith.constant 0 : index
    %c0_89 = arith.constant 0 : index
    %61 = vector.load %arg9[%c0_88, %c0_89] : memref<1x128xf32, #tpu.memory_space<vmem>>, vector<1x128xf32>
    %62 = vector.broadcast %61 : vector<1x128xf32> to vector<16x128xf32>
    %63 = arith.addf %60, %62 : vector<16x128xf32>
    %cst_90 = arith.constant 0.000000e+00 : f32
    %64 = vector.broadcast %cst_90 : f32 to vector<16x128xf32>
    %65 = arith.maximumf %63, %64 : vector<16x128xf32>
    %66 = vector.shape_cast %65 : vector<16x128xf32> to vector<1x16x128xf32>
    %c0_91 = arith.constant 0 : index
    %c8_92 = arith.constant 8 : index
    %c0_93 = arith.constant 0 : index
    %67 = vector.load %arg14[%c0_91, %c8_92, %c0_93] : memref<1x32x128xf32, #tpu.memory_space<vmem>>, vector<1x16x128xf32>
    tpu.vector_store %arg14[%c0_91, %c8_92, %c0_93], %66 {strides = array<i32>} : memref<1x32x128xf32, #tpu.memory_space<vmem>>, vector<1x16x128xf32>,
    %c0_94 = arith.constant 0 : index
    %c5 = arith.constant 5 : index
    %c0_95 = arith.constant 0 : index
    %68 = vector.load %arg14[%c0_94, %c5, %c0_95] : memref<1x32x128xf32, #tpu.memory_space<vmem>>, vector<1x16x128xf32>
    %69 = vector.shape_cast %68 : vector<1x16x128xf32> to vector<16x128xf32>
    %c0_96 = arith.constant 0 : index
    %c0_97 = arith.constant 0 : index
    %70 = vector.load %arg16[%c0_96, %c0_97] : memref<16x384xf32, #tpu.memory_space<vmem>>, vector<16x128xf32>
    tpu.vector_store %arg16[%c0_96, %c0_97], %69 {strides = array<i32>} : memref<16x384xf32, #tpu.memory_space<vmem>>, vector<16x128xf32>,
    %c0_98 = arith.constant 0 : index
    %c8_99 = arith.constant 8 : index
    %c0_100 = arith.constant 0 : index
    %71 = vector.load %arg14[%c0_98, %c8_99, %c0_100] : memref<1x32x128xf32, #tpu.memory_space<vmem>>, vector<1x16x128xf32>
    %72 = vector.shape_cast %71 : vector<1x16x128xf32> to vector<16x128xf32>
    %c0_101 = arith.constant 0 : index
    %c128_102 = arith.constant 128 : index
    %73 = vector.load %arg16[%c0_101, %c128_102] : memref<16x384xf32, #tpu.memory_space<vmem>>, vector<16x128xf32>
    tpu.vector_store %arg16[%c0_101, %c128_102], %72 {strides = array<i32>} : memref<16x384xf32, #tpu.memory_space<vmem>>, vector<16x128xf32>,
    %c0_103 = arith.constant 0 : index
    %c11 = arith.constant 11 : index
    %c0_104 = arith.constant 0 : index
    %74 = vector.load %arg14[%c0_103, %c11, %c0_104] : memref<1x32x128xf32, #tpu.memory_space<vmem>>, vector<1x16x128xf32>
    %75 = vector.shape_cast %74 : vector<1x16x128xf32> to vector<16x128xf32>
    %c0_105 = arith.constant 0 : index
    %c256_106 = arith.constant 256 : index
    %76 = vector.load %arg16[%c0_105, %c256_106] : memref<16x384xf32, #tpu.memory_space<vmem>>, vector<16x128xf32>
    tpu.vector_store %arg16[%c0_105, %c256_106], %75 {strides = array<i32>} : memref<16x384xf32, #tpu.memory_space<vmem>>, vector<16x128xf32>,
    %c0_107 = arith.constant 0 : index
    %c0_108 = arith.constant 0 : index
    %77 = vector.load %arg16[%c0_107, %c0_108] : memref<16x384xf32, #tpu.memory_space<vmem>>, vector<16x384xf32>
    %c0_109 = arith.constant 0 : index
    %c0_110 = arith.constant 0 : index
    %78 = vector.load %arg5[%c0_109, %c0_110] : memref<384x128xf32, #tpu.memory_space<vmem>>, vector<384x128xf32>
    %cst_111 = arith.constant dense<0.000000e+00> : vector<16x128xf32>
    %79 = tpu.matmul %77, %78, %cst_111 {dimension_numbers = #tpu.dot_dimension_numbers<[1], [0], [0], [1], [0, 0, 1, 1], [], []>} : vector<16x384xf32>, vector<384x128xf32>, vector<16x128xf32> -> vector<16x128xf32>
    %c0_112 = arith.constant 0 : index
    %c0_113 = arith.constant 0 : index
    %80 = vector.load %arg10[%c0_112, %c0_113] : memref<1x128xf32, #tpu.memory_space<vmem>>, vector<1x128xf32>
    %81 = vector.broadcast %80 : vector<1x128xf32> to vector<16x128xf32>
    %82 = arith.addf %79, %81 : vector<16x128xf32>
    %cst_114 = arith.constant 0.000000e+00 : f32
    %83 = vector.broadcast %cst_114 : f32 to vector<16x128xf32>
    %84 = arith.maximumf %82, %83 : vector<16x128xf32>
    %c0_115 = arith.constant 0 : index
    %c0_116 = arith.constant 0 : index
    %c0_117 = arith.constant 0 : index
    %85 = vector.load %arg1[%c0_115, %c0_116, %c0_117] : memref<1x16x64xf32, #tpu.memory_space<vmem>>, vector<1x16x64xf32>
    %86 = vector.shape_cast %85 : vector<1x16x64xf32> to vector<16x64xf32>
    %c0_118 = arith.constant 0 : index
    %c0_119 = arith.constant 0 : index
    %87 = vector.load %arg6[%c0_118, %c0_119] : memref<64x128xf32, #tpu.memory_space<vmem>>, vector<64x128xf32>
    %cst_120 = arith.constant dense<0.000000e+00> : vector<16x128xf32>
    %88 = tpu.matmul %86, %87, %cst_120 {dimension_numbers = #tpu.dot_dimension_numbers<[1], [0], [0], [1], [0, 0, 1, 1], [], []>} : vector<16x64xf32>, vector<64x128xf32>, vector<16x128xf32> -> vector<16x128xf32>
    %c0_121 = arith.constant 0 : index
    %c0_122 = arith.constant 0 : index
    %89 = vector.load %arg11[%c0_121, %c0_122] : memref<1x128xf32, #tpu.memory_space<vmem>>, vector<1x128xf32>
    %90 = vector.broadcast %89 : vector<1x128xf32> to vector<16x128xf32>
    %91 = arith.addf %88, %90 : vector<16x128xf32>
    %cst_123 = arith.constant 0.000000e+00 : f32
    %92 = vector.broadcast %cst_123 : f32 to vector<16x128xf32>
    %93 = arith.maximumf %91, %92 : vector<16x128xf32>
    %94 = arith.addf %84, %93 : vector<16x128xf32>
    %95 = vector.shape_cast %94 : vector<16x128xf32> to vector<1x16x128xf32>
    %c0_124 = arith.constant 0 : index
    %c0_125 = arith.constant 0 : index
    %c0_126 = arith.constant 0 : index
    %96 = vector.load %arg12[%c0_124, %c0_125, %c0_126] : memref<1x16x128xf32, #tpu.memory_space<vmem>>, vector<1x16x128xf32>
    tpu.vector_store %arg12[%c0_124, %c0_125, %c0_126], %95 {strides = array<i32>} : memref<1x16x128xf32, #tpu.memory_space<vmem>>, vector<1x16x128xf32>,
    return
  }
  func.func @transform_0(%arg0: i32) -> (i32, i32, i32) {
    %c0_i32 = arith.constant 0 : i32
    %c0_i32_0 = arith.constant 0 : i32
    %c0_i32_1 = arith.constant 0 : i32
    return %arg0, %c0_i32, %c0_i32_0 : i32, i32, i32
  }
  func.func @transform_1(%arg0: i32) -> (i32, i32) {
    %c0_i32 = arith.constant 0 : i32
    %c0_i32_0 = arith.constant 0 : i32
    %c0_i32_1 = arith.constant 0 : i32
    return %c0_i32, %c0_i32_0 : i32, i32
  }
  func.func @transform_2(%arg0: i32) -> (i32, i32) {
    %c0_i32 = arith.constant 0 : i32
    %c0_i32_0 = arith.constant 0 : i32
    %c0_i32_1 = arith.constant 0 : i32
    return %c0_i32, %c0_i32_0 : i32, i32
  }
  func.func @transform_3(%arg0: i32) -> (i32, i32) {
    %c0_i32 = arith.constant 0 : i32
    %c0_i32_0 = arith.constant 0 : i32
    %c0_i32_1 = arith.constant 0 : i32
    return %c0_i32, %c0_i32_0 : i32, i32
  }
  func.func @transform_4(%arg0: i32) -> (i32, i32) {
    %c0_i32 = arith.constant 0 : i32
    %c0_i32_0 = arith.constant 0 : i32
    %c0_i32_1 = arith.constant 0 : i32
    return %c0_i32, %c0_i32_0 : i32, i32
  }
  func.func @transform_5(%arg0: i32) -> (i32, i32) {
    %c0_i32 = arith.constant 0 : i32
    %c0_i32_0 = arith.constant 0 : i32
    %c0_i32_1 = arith.constant 0 : i32
    return %c0_i32, %c0_i32_0 : i32, i32
  }
  func.func @transform_6(%arg0: i32) -> (i32, i32) {
    %c0_i32 = arith.constant 0 : i32
    %c0_i32_0 = arith.constant 0 : i32
    %c0_i32_1 = arith.constant 0 : i32
    return %c0_i32, %c0_i32_0 : i32, i32
  }
  func.func @transform_7(%arg0: i32) -> (i32, i32) {
    %c0_i32 = arith.constant 0 : i32
    %c0_i32_0 = arith.constant 0 : i32
    %c0_i32_1 = arith.constant 0 : i32
    return %c0_i32, %c0_i32_0 : i32, i32
  }
  func.func @transform_8(%arg0: i32) -> (i32, i32) {
    %c0_i32 = arith.constant 0 : i32
    %c0_i32_0 = arith.constant 0 : i32
    %c0_i32_1 = arith.constant 0 : i32
    return %c0_i32, %c0_i32_0 : i32, i32
  }
  func.func @transform_9(%arg0: i32) -> (i32, i32) {
    %c0_i32 = arith.constant 0 : i32
    %c0_i32_0 = arith.constant 0 : i32
    %c0_i32_1 = arith.constant 0 : i32
    return %c0_i32, %c0_i32_0 : i32, i32
  }
  func.func @transform_10(%arg0: i32) -> (i32, i32) {
    %c0_i32 = arith.constant 0 : i32
    %c0_i32_0 = arith.constant 0 : i32
    %c0_i32_1 = arith.constant 0 : i32
    return %c0_i32, %c0_i32_0 : i32, i32
  }
  func.func @transform_11(%arg0: i32) -> (i32, i32, i32) {
    %c0_i32 = arith.constant 0 : i32
    %c0_i32_0 = arith.constant 0 : i32
    %c0_i32_1 = arith.constant 0 : i32
    return %arg0, %c0_i32, %c0_i32_0 : i32, i32, i32
  }
}

</mosaic_0001>

<bundles_post_ra>
// kernel: tpu_custom_call.1
= control target key start
LH: loop header
LB: loop body
LE: loop exit
PB: predicated region body
PF: predicated region fallthrough
CT: control target
= control target key end

     0   :  { %s1919_s0 = inlined_call_operand.hbm [shape: f32[2,16,64], index: 0, kind: input, shape index: {}]   ;;  %s1920_s1 = inlined_call_operand.hbm [shape: f32[192,128], index: 1, kind: input, shape index: {}]   ;;  %s1921_s2 = inlined_call_operand.hbm [shape: f32[384,128], index: 2, kind: input, shape index: {}]   ;;  %s1922_s3 = inlined_call_operand.hbm [shape: f32[384,128], index: 3, kind: input, shape index: {}]   ;;  %s1923_s4 = inlined_call_operand.hbm [shape: f32[384,128], index: 4, kind: input, shape index: {}]   ;;  %s1924_s5 = inlined_call_operand.hbm [shape: f32[64,128], index: 5, kind: input, shape index: {}]   ;;  %s1925_s6 = inlined_call_operand.vmem [shape: f32[1,128], index: 6, kind: input, shape index: {}]   ;;  %s1926_s7 = inlined_call_operand.vmem [shape: f32[1,128], index: 7, kind: input, shape index: {}]   ;;  %s1927_s8 = inlined_call_operand.vmem [shape: f32[1,128], index: 8, kind: input, shape index: {}]   ;;  %s1928_s9 = inlined_call_operand.vmem [shape: f32[1,128], index: 9, kind: input, shape index: {}]   ;;  %s1929_s10 = inlined_call_operand.vmem [shape: f32[1,128], index: 10, kind: input, shape index: {}]   ;;  %s1930_s11 = inlined_call_operand.hbm [shape: f32[2,16,128], index: 11, kind: output, shape index: {}]  }
   0x1   :  { %1933 = sst [smem:[#allocation23_spill]] %s1920_s1 }
   0x2   :  { %1934 = sst [smem:[#allocation24_spill]] %s1921_s2 }
   0x3   :  { %1935 = sst [smem:[#allocation25_spill]] %s1922_s3 }
   0x4   :  { %1936 = sst [smem:[#allocation26_spill]] %s1923_s4 }
   0x5   :  { %1937 = sst [smem:[#allocation27_spill]] %s1924_s5 }
   0x6   :  { %16 = vsyncpa [#allocation7], 0 }
   0x7   :  { %18 = vsyncpa [#allocation7 + $0x1], 0 }
   0x8   :  { %19 = vsyncpa [#allocation10], 0 }
   0x9   :  { %20 = vsyncpa [#allocation13], 0 }
   0xa   :  { %21 = vsyncpa [#allocation16], 0 }
   0xb   :  { %22 = vsyncpa [#allocation8], 0 }
   0xc   :  { %24 = vsyncpa [#allocation8 + $0x1], 0  ;;  %s1692_s17 = smov 0   ;;  %s1694_s18 = smov 0  }
   0xd   :  { %s1696_s19 = smov 0   ;;  %s1698_s20 = smov 0  }
   0xe LB: > { %s1938_s1 = sld [smem:[#allocation23_spill]]  ;;  %s1716_s24 = sadd.s32 4294967295, %s1619_s20   ;;  %s1619_s20 = sphi %s1698_s20, %s1955_s20   ;;  %s1615_s19 = sphi %s1696_s19, %s1954_s19   ;;  %s1611_s18 = sphi %s1694_s18, %s1953_s18   ;;  %s1607_s17 = sphi %s1692_s17, %s1952_s17  }
   0xf   : > { %p1224_p0 = scmp.ge.s32.totalorder %s1619_s20, 1  ;;  %p51_p1 = scmp.eq.s32.totalorder %s1716_s24, 0 }
  0x10   : > { %p297_p2 = scmp.lt.s32.totalorder %s1619_s20, 3  ;;  %s1621_s26 = smov [#allocation9]  }
  0x11   : > { %s310_s27 = sshll.u32 %s1621_s26, 4  ;;  %s1940_s3 = sld [smem:[#allocation25_spill]]  ;;  %s311_s27 = int_to_ptr.vmem [resolvable:$true] %s310_s27 }
  0x12   : > { %p1721_p3 = pnand %p1224_p0, %p297_p2  ;;  %s1942_s2 = sld [smem:[#allocation24_spill]] }
  0x13   : > { %s1622_s16 = smov [#allocation12]   ;;  %s1931_s22 = smov 128  }
  0x14   : > { %s308_s23 = sshll.u32 %s1938_s1, 4  ;;  %p1277_p4 = pneg %p1721_p3  ;;  %s309_s23 = int_to_ptr.hbm [resolvable:$true] %s308_s23 }
  0x15   : > { %s338_s21 = sshll.u32 %s1622_s16, 4  ;;  %s1932_s26 = smov 8   ;;  %s339_s21 = int_to_ptr.vmem [resolvable:$true] %s338_s21 }
  0x16   : > { %p1733_p6 = pnand %p1277_p4, %p51_p1  ;;  %s1943_s4 = sld [smem:[#allocation26_spill]] }
  0x17   : > { %s336_s30 = sshll.u32 %s1940_s3, 4  ;;  %s1625_s14 = smov [#allocation11]   ;;  %s337_s30 = int_to_ptr.hbm [resolvable:$true] %s336_s30 }
  0x18   : > { %s322_s15 = sshll.u32 %s1942_s2, 4  ;;  %s324_s16 = sshll.u32 %s1625_s14, 4  ;;  %s323_s15 = int_to_ptr.hbm [resolvable:$true] %s322_s15  ;;  %s325_s16 = int_to_ptr.vmem [resolvable:$true] %s324_s16 }
  0x19   : > { %1280 = dma.hbm_to_vmem [thread:$0]  (!%p1733_p6), %s309_s23, 3072, %s311_s27, [#allocation10], %s1931_s22, %s1931_s22, %s1932_s26  }
  0x1a   : > { %1286 = dma.hbm_to_vmem [thread:$0]  (!%p1733_p6), %s337_s30, 6144, %s339_s21, [#allocation13], %s1931_s22, %s1931_s22, %s1932_s26  }
  0x1b   : > { %1283 = dma.hbm_to_vmem [thread:$0]  (!%p1733_p6), %s323_s15, 6144, %s325_s16, [#allocation10], %s1931_s22, %s1931_s22, %s1932_s26  }
  0x1c   : > { %s350_s13 = sshll.u32 %s1943_s4, 4  ;;  %s1626_s23 = smov [#allocation14]   ;;  %s351_s13 = int_to_ptr.hbm [resolvable:$true] %s350_s13 }
  0x1d   : > { %s352_s27 = sshll.u32 %s1626_s23, 4  ;;  %s1944_s5 = sld [smem:[#allocation27_spill]]  ;;  %s353_s27 = int_to_ptr.vmem [resolvable:$true] %s352_s27 }
  0x1e   : > { %1289 = dma.hbm_to_vmem [thread:$0]  (!%p1733_p6), %s351_s13, 6144, %s353_s27, [#allocation13], %s1931_s22, %s1931_s22, %s1932_s26  }
  0x1f   : > { %s1627_s15 = smov [#allocation15]   ;;  %s1223_s14 = sadd.s32 4294967294, %s1619_s20  }
  0x20   : > { %s366_s29 = sshll.u32 %s1627_s15, 4  ;;  %s1773_s16 = sadd.s32 1, %s1619_s20   ;;  %s367_s29 = int_to_ptr.vmem [resolvable:$true] %s366_s29 }
  0x21   : > { %s37_s23 = sadd.s32 1, %s1615_s19  ;;  %s34_s30 = ssub.s32 %s1619_s20, %s1773_s16 }
  0x22   : > { %p44_p7 = scmp.ne.s32.totalorder %s1615_s19, %s1611_s18  ;;  %p35_p8 = scmp.eq.s32.totalorder %s34_s30, 0 }
  0x23   : > { %s364_s28 = sshll.u32 %s1944_s5, 4  ;;  %p45_p9 = scmp.eq.s32.totalorder %s1619_s20, 0  ;;  %s365_s28 = int_to_ptr.hbm [resolvable:$true] %s364_s28 }
  0x24   : > { %1292 = dma.hbm_to_vmem [thread:$0]  (!%p1733_p6), %s365_s28, 1024, %s367_s29, [#allocation16], %s1931_s22, %s1931_s22, %s1932_s26  }
  0x25   : > { %p50_p10 = scmp.ne.s32.totalorder %s1611_s18, %s1607_s17  ;;  %p284_p11 = scmp.eq.s32.totalorder %s1716_s24, 1 }
  0x26   : > { %s1785_s13 = scalar_select %p35_p8, %s1615_s19, %s37_s23  }
  0x27   : > { %p1789_p12 = por %p51_p1, %p50_p10  ;;  %p1793_p13 = por %p284_p11, %p44_p7 }
  0x28   : > { %p290_p0 = scmp.eq.s32.totalorder %s1223_s14, 1  ;;  %p46_p2 = por %p45_p9, %p44_p7 }
  0x29   : > { %s395_s21 = sand.u32 1, %s1615_s19   ;;  %p1306_p6 = scmp.lt.s32.totalorder %s1619_s20, 2 }
  0x2a   : > { %p1798_p4 = por %p290_p0, %p50_p10  ;;  %s1231_s15 = sshll.u32 %s395_s21, 4 }
  0x2b   : > { %s1251_s29 = sshll.u32 %s1619_s20, 4  ;;  %s399_s1 = scalar_lea.vmem [#allocation6], %s1231_s15 }
  0x2c   : > { %s404_s22 = scalar_lea.hbm %s1919_s0, %s1251_s29  ;;  %s407_s2 = sshll.u32 %s399_s1, 4  ;;  %s408_s2 = int_to_ptr.vmem [resolvable:$true] %s407_s2 }
  0x2d   : > { %s405_s26 = sshll.u32 %s404_s22, 4  ;;  %p1807_p8 = pnand %p1306_p6, %p46_p2  ;;  %s406_s26 = int_to_ptr.hbm [resolvable:$true] %s405_s26 }
  0x2e   : > { %s396_s3 = scalar_lea.sflag [#allocation7], %s395_s21  ;;  %s1511_s4 = sshra.s32 %s406_s26, 4  ;;  %s1512_s4 = int_to_ptr.hbm [resolvable:$true] %s1511_s4 }
  0x2f   : > { %s1513_s5 = scalar_lea.hbm %s1512_s4, 16  ;;  %p1515_p9 = pneg %p1807_p8 }
  0x30   : > { %p1514_p7 = scmp.ne.s32.totalorder %s1512_s4, %s1513_s5  ;;  %s1518_s1 = scalar_lea.hbm %s1919_s0, 32 }
  0x31   : > { %p1519_p0 = scmp.lt.s32.totalorder %s1512_s4, %s1919_s0  ;;  %p1520_p2 = scmp.lt.s32.totalorder %s1518_s1, %s1513_s5 }
  0x32   : > { %p1516_p10 = pnand %p1515_p9, %p1514_p7 }
  0x33   : > { %p1521_p6 = por %p1520_p2, %p1519_p0 }
  0x34   : > { %p1517_p11 = pneg %p1516_p10 }
  0x36   : > { %p1522_p5 = pnand %p1521_p6, %p1517_p11 }
  0x38   : > { %1525 = shalt.err (!%p1522_p5)
}
  0x39   : > { %s1949_s21 = smov 8   ;;  %s1950_s30 = smov 128  }
  0x3a   : > { %1296 = dma.hbm_to_vmem [thread:$0]  (!%p1807_p8), %s406_s26, 256, %s408_s2, %s396_s3, %s1950_s30, %s1950_s30, %s1949_s21  }
  0x3b   : > { %419 = sbr.rel (%p1721_p3) target bundleno = 809 (0x329), region = 64  ;;  %s1827_s29 = sand.u32 (!%p1721_p3), 1, %s1611_s18  }
  0x3c   : > { %s1235_s4 = sshll.u32 (!%p1721_p3), %s1827_s29, 4  ;;  %s422_s5 = scalar_lea.sflag (!%p1721_p3), [#allocation7], %s1827_s29 }
  0x3d   : > { %s425_s22 = scalar_lea.vmem (!%p1721_p3), [#allocation6], %s1235_s4 }
  0x40   : > { %1586 = dma.done.wait (%p1789_p12), %s422_s5, 256  }
  0x41   : > { %1588 = vsyncadd (%p1789_p12), %s422_s5, 4294967040 }
  0x42   : > { %1590 = dma.done.wait (%p51_p1), [#allocation10], 9216  }
  0x43   : > { %1592 = vsyncadd (%p51_p1), [#allocation10], 4294958080 }
  0x44   : > { %1594 = dma.done.wait (%p51_p1), [#allocation13], 12288  }
  0x45   : > { %1596 = vsyncadd (%p51_p1), [#allocation13], 4294955008 }
  0x46   : > { %1598 = dma.done.wait (%p51_p1), [#allocation16], 1024  }
  0x47   : > { %1600 = vsyncadd (%p51_p1), [#allocation16], 4294966272  ;;  %vm490_vm0 = vcmask 523264   ;;  %v1628_v0 = vmov 0.0   ;;  %v1851_v1 = vld [vmem:[%s425_s22] sm:$0xff]  ;;  %v1853_v2 = vld [vmem:[%s425_s22 + $0x8] sm:$0xff] }
  0x48   : > { %491 = vst.msk [vmem:[#allocation2] sm:$0xff] %vm490_vm0, %v1628_v0  ;;  %v541_v3 = vld [vmem:[#allocation9 + $0x78] sm:$0xff]  ;;  %v540_v4 = vld [vmem:[#allocation9 + $0x70] sm:$0xff]  ;;  %v539_v5 = vld [vmem:[#allocation9 + $0x68] sm:$0xff]  ;;  %s1629_s2 = smov 64   ;;  %vm515_vm1 = vcmask 1048064  }
  0x49   : > { %492 = vst.msk [vmem:[#allocation2 + $0x18] sm:$0xff] %vm490_vm0, %v1628_v0  ;;  %560 = vmatpush.msra.mxu0 %v541_v3  ;;  %v538_v6 = vld [vmem:[#allocation9 + $0x60] sm:$0xff]  ;;  %v549_v7 = vld [vmem:[#allocation9 + $0xb8] sm:$0xff]  ;;  %v548_v8 = vld [vmem:[#allocation9 + $0xb0] sm:$0xff]  ;;  %s1252_s5 = sshll.u32 %s1716_s24, 4  ;;  %s489_s22 = scalar_lea.vmem [#allocation17], %s1235_s4 }
  0x4a   : > { %493 = vst [vmem:[#allocation3] sm:$0xff] %v1628_v0  ;;  %v537_v9 = vld [vmem:[#allocation9 + $0x58] sm:$0xff]  ;;  %591 = vmatpush.msra.mxu1 %v549_v7  ;;  %v547_v10 = vld [vmem:[#allocation9 + $0xa8] sm:$0xff]  ;;  %v536_v12 = vld [vmem:[#allocation9 + $0x50] sm:$0xff]  ;;  %s1098_s25 = scalar_lea.hbm %s1930_s11, %s1252_s5  ;;  %s1099_s26 = sshll.u32 %s489_s22, 4  ;;  %s1100_s26 = int_to_ptr.vmem [resolvable:$true] %s1099_s26 }
  0x4b   : > { %494 = vst [vmem:[#allocation3 + $0x18] sm:$0xff] %v1628_v0  ;;  %561 = vmatpush.msra.mxu0 %v540_v4  ;;  %v535_v13 = vld [vmem:[#allocation9 + $0x48] sm:$0xff]  ;;  %v534_v14 = vld [vmem:[#allocation9 + $0x40] sm:$0xff]  ;;  %v533_v16 = vld [vmem:[#allocation9 + $0x38] sm:$0xff]  ;;  %s1101_s12 = sshll.u32 %s1098_s25, 4  ;;  %s1087_s24 = scalar_lea.sflag [#allocation8], %s1827_s29  ;;  %s1102_s12 = int_to_ptr.hbm [resolvable:$true] %s1101_s12 }
  0x4c   : > { %495 = vst [vmem:[#allocation4] sm:$0xff] %v1628_v0  ;;  %592 = vmatpush.msra.mxu1 %v548_v8  ;;  %v532_v17 = vld [vmem:[#allocation9 + $0x30] sm:$0xff]  ;;  %v531_v18 = vld [vmem:[#allocation9 + $0x28] sm:$0xff]  ;;  %v530_v19 = vld [vmem:[#allocation9 + $0x20] sm:$0xff]  ;;  %s1555_s14 = sshra.s32 %s1102_s12, 4  ;;  %s1561_s23 = scalar_lea.hbm %s1930_s11, 32  ;;  %s1556_s14 = int_to_ptr.hbm [resolvable:$true] %s1555_s14 }
  0x4d   : > { %496 = vst [vmem:[#allocation4 + $0x18] sm:$0xff] %v1628_v0  ;;  %562 = vmatpush.msra.mxu0 %v539_v5  ;;  %v529_v21 = vld [vmem:[#allocation9 + $0x18] sm:$0xff]  ;;  %v546_v22 = vld [vmem:[#allocation9 + $0xa0] sm:$0xff]  ;;  %v528_v23 = vld [vmem:[#allocation9 + $0x10] sm:$0xff]  ;;  %s1557_s4 = scalar_lea.hbm %s1556_s14, 16  ;;  %p1562_p12 = scmp.lt.s32.totalorder %s1556_s14, %s1930_s11 }
  0x4e   : > { %499 = vst.msk [vmem:[#allocation2 + $0x8] sm:$0xff] %vm490_vm0, %v1851_v1  ;;  %593 = vmatpush.msra.mxu1 %v547_v10  ;;  %v545_v24 = vld [vmem:[#allocation9 + $0x98] sm:$0xff]  ;;  %v527_v25 = vld [vmem:[#allocation9 + $0x8] sm:$0xff]  ;;  %v544_v26 = vld [vmem:[#allocation9 + $0x90] sm:$0xff]  ;;  %p1558_p1 = scmp.ne.s32.totalorder %s1556_s14, %s1557_s4  ;;  %p1563_p8 = scmp.lt.s32.totalorder %s1561_s23, %s1557_s4 }
  0x4f   : > { %500 = vst.msk [vmem:[#allocation2 + $0x10] sm:$0xff] %vm490_vm0, %v1853_v2  ;;  %563 = vmatpush.msra.mxu0 %v538_v6  ;;  %v526_v28 = vld [vmem:[#allocation9] sm:$0xff]  ;;  %v543_v29 = vld [vmem:[#allocation9 + $0x88] sm:$0xff]  ;;  %v643_v34 = vld [vmem:[#allocation11 + $0x78] sm:$0xff] }
  0x50   : > { %594 = vmatpush.msra.mxu1 %v546_v22  ;;  %v542_v31 = vld [vmem:[#allocation9 + $0x80] sm:$0xff]  ;;  %v659_v35 = vld [vmem:[#allocation11 + $0xf8] sm:$0xff]  ;;  %v642_v36 = vld [vmem:[#allocation11 + $0x70] sm:$0xff]  ;;  %680 = vmatpush.msra.mxu2 %v643_v34  ;;  %p1559_p3 = pnand %p1558_p1, %p1793_p13  ;;  %p1564_p7 = por %p1563_p8, %p1562_p12 }
  0x51   : > { %564 = vmatpush.msra.mxu0 %v537_v9  ;;  %703 = vmatpush.msra.mxu3 %v659_v35  ;;  %v658_v38 = vld [vmem:[#allocation11 + $0xf0] sm:$0xff]  ;;  %v641_v39 = vld [vmem:[#allocation11 + $0x68] sm:$0xff]  ;;  %v640_v41 = vld [vmem:[#allocation11 + $0x60] sm:$0xff] }
  0x52   : > { %595 = vmatpush.msra.mxu1 %v545_v24  ;;  %681 = vmatpush.msra.mxu2 %v642_v36  ;;  %v657_v40 = vld [vmem:[#allocation11 + $0xe8] sm:$0xff]  ;;  %v656_v42 = vld [vmem:[#allocation11 + $0xe0] sm:$0xff]  ;;  %v655_v47 = vld [vmem:[#allocation11 + $0xd8] sm:$0xff]  ;;  %p1560_p5 = pneg %p1559_p3 }
  0x53   : > { %565 = vmatpush.msra.mxu0 %v536_v12  ;;  %704 = vmatpush.msra.mxu3 %v658_v38  ;;  %v654_v48 = vld [vmem:[#allocation11 + $0xd0] sm:$0xff]  ;;  %v653_v49 = vld [vmem:[#allocation11 + $0xc8] sm:$0xff]  ;;  %v652_v50 = vld [vmem:[#allocation11 + $0xc0] sm:$0xff] }
  0x54   : > { %596 = vmatpush.msra.mxu1 %v544_v26  ;;  %682 = vmatpush.msra.mxu2 %v641_v39  ;;  %v639_v51 = vld [vmem:[#allocation11 + $0x58] sm:$0xff]  ;;  %v638_v54 = vld [vmem:[#allocation11 + $0x50] sm:$0xff]  ;;  %v637_v57 = vld [vmem:[#allocation11 + $0x48] sm:$0xff]  ;;  %p1565_p9 = pnand %p1564_p7, %p1560_p5 }
  0x55   : > { %v505_v11 = vld [vmem:[#allocation2 + $0x8] sm:$0xff]  ;;  %566 = vmatpush.msra.mxu0 %v535_v13  ;;  %705 = vmatpush.msra.mxu3 %v657_v40  ;;  %v674_v55 = vld [vmem:[#allocation11 + $0x170] sm:$0xff]  ;;  %v673_v58 = vld [vmem:[#allocation11 + $0x168] sm:$0xff] }
  0x56   : > { %509 = vrot.lane.b32.xlu0 %v505_v11, %s1629_s2  ;;  %v506_v15 = vld [vmem:[#allocation2 + $0x10] sm:$0xff]  ;;  %v501_v20 = vld [vmem:[#allocation2 + $0x7] sm:$0xff]  ;;  %597 = vmatpush.msra.mxu1 %v543_v29  ;;  %v649_v59 = vld [vmem:[#allocation11 + $0xa8] sm:$0xff] }
  0x57   : > { %567 = vmatpush.msra.mxu0 %v534_v14  ;;  %503 = vst.msk [vmem:[#allocation5] sm:$0xff] %vm490_vm0, %v501_v20  ;;  %v518_v27 = vld [vmem:[#allocation2 + $0x9] sm:$0xff]  ;;  %v519_v32 = vld [vmem:[#allocation2 + $0x11] sm:$0xff]  ;;  %683 = vmatpush.msra.mxu2 %v640_v41  ;;  %v650_v56 = vld [vmem:[#allocation11 + $0xb0] sm:$0xff] }
  0x58   : > { %520 = vst.msk [vmem:[#allocation5 + $0x8] sm:$0xff] %vm490_vm0, %v518_v27  ;;  %v502_v30 = vld [vmem:[#allocation2 + $0xf] sm:$0xff]  ;;  %598 = vmatpush.msra.mxu1 %v542_v31  ;;  %706 = vmatpush.msra.mxu3 %v656_v42  ;;  %v634_v4 = vld [vmem:[#allocation11 + $0x30] sm:$0xff]  ;;  %v633_v7 = vld [vmem:[#allocation11 + $0x28] sm:$0xff] }
  0x59   : > { %568 = vmatpush.msra.mxu0 %v533_v16  ;;  %504 = vst.msk [vmem:[#allocation5 + $0x18] sm:$0xff] %vm490_vm0, %v502_v30  ;;  %v675_v52 = vld [vmem:[#allocation11 + $0x178] sm:$0xff]  ;;  %684 = vmatpush.msra.mxu2 %v639_v51  ;;  %v636_v60 = vld [vmem:[#allocation11 + $0x40] sm:$0xff]  ;;  %v670_v5 = vld [vmem:[#allocation11 + $0x150] sm:$0xff] }
  0x5a   : > { %521 = vst.msk [vmem:[#allocation5 + $0x20] sm:$0xff] %vm490_vm0, %v519_v32  ;;  %707 = vmatpush.msra.mxu3 %v655_v47  ;;  %v651_v53 = vld [vmem:[#allocation11 + $0xb8] sm:$0xff]  ;;  %726 = vmatpush.msrb.mxu1 %v675_v52  ;;  %v672_v61 = vld [vmem:[#allocation11 + $0x160] sm:$0xff]  ;;  %v646_v6 = vld [vmem:[#allocation11 + $0x90] sm:$0xff] }
  0x5b   : > { %569 = vmatpush.msra.mxu0 %v532_v17  ;;  %685 = vmatpush.msra.mxu2 %v638_v54  ;;  %v648_v62 = vld [vmem:[#allocation11 + $0xa0] sm:$0xff]  ;;  %v635_v63 = vld [vmem:[#allocation11 + $0x38] sm:$0xff]  ;;  %v669_v8 = vld [vmem:[#allocation11 + $0x148] sm:$0xff] }
  0x5c   : > { %708 = vmatpush.msra.mxu3 %v654_v48  ;;  %727 = vmatpush.msrb.mxu1 %v674_v55  ;;  %v671_v0 = vld [vmem:[#allocation11 + $0x158] sm:$0xff]  ;;  %v645_v9 = vld [vmem:[#allocation11 + $0x88] sm:$0xff]  ;;  %v632_v10 = vld [vmem:[#allocation11 + $0x20] sm:$0xff] }
  0x5d   : > { %570 = vmatpush.msra.mxu0 %v531_v18  ;;  %686 = vmatpush.msra.mxu2 %v637_v57  ;;  %v647_v3 = vld [vmem:[#allocation11 + $0x98] sm:$0xff]  ;;  %v668_v11 = vld [vmem:[#allocation11 + $0x140] sm:$0xff]  ;;  %v666_v16 = vld [vmem:[#allocation11 + $0x130] sm:$0xff] }
  0x5e   : > { %511 = vrot.lane.b32.xlu0 %v506_v15, %s1629_s2  ;;  %709 = vmatpush.msra.mxu3 %v653_v49  ;;  %v644_v12 = vld [vmem:[#allocation11 + $0x80] sm:$0xff]  ;;  %v631_v13 = vld [vmem:[#allocation11 + $0x18] sm:$0xff]  ;;  %v630_v15 = vld [vmem:[#allocation11 + $0x10] sm:$0xff] }
  0x5f   : > { %571 = vmatpush.msra.mxu0 %v530_v19  ;;  %v523_v33 = vld [vmem:[#allocation5 + $0x8] sm:$0xff]  ;;  %728 = vmatpush.msrb.mxu1 %v673_v58  ;;  %v629_v17 = vld [vmem:[#allocation11 + $0x8] sm:$0xff]  ;;  %v628_v19 = vld [vmem:[#allocation11] sm:$0xff] }
  0x60   : > { %1242 = vmatmul.msk.f32.vlgmr.msra.gmra.mxu1 %vm490_vm0, %v523_v33  ;;  %710 = vmatpush.msra.mxu3 %v652_v50  ;;  %v667_v14 = vld [vmem:[#allocation11 + $0x138] sm:$0xff]  ;;  %v665_v18 = vld [vmem:[#allocation11 + $0x128] sm:$0xff]  ;;  %v664_v20 = vld [vmem:[#allocation11 + $0x120] sm:$0xff] }
  0x61   : > { %572 = vmatpush.msra.mxu0 %v529_v21  ;;  %v525_v37 = vld [vmem:[#allocation5 + $0x20] sm:$0xff]  ;;  %687 = vmatpush.msra.mxu2 %v636_v60  ;;  %v663_v21 = vld [vmem:[#allocation11 + $0x118] sm:$0xff]  ;;  %v660_v24 = vld [vmem:[#allocation11 + $0x100] sm:$0xff] }
  0x62   : > { %711 = vmatpush.msra.mxu3 %v651_v53  ;;  %729 = vmatpush.msrb.mxu1 %v672_v61  ;;  %v662_v22 = vld [vmem:[#allocation11 + $0x110] sm:$0xff]  ;;  %v786_v27 = vld [vmem:[#allocation12 + $0x78] sm:$0xff]  ;;  %v784_v33 = vld [vmem:[#allocation12 + $0x68] sm:$0xff] }
  0x63   : > { %573 = vmatpush.msra.mxu0 %v528_v23  ;;  %688 = vmatpush.msra.mxu2 %v635_v63  ;;  %v661_v23 = vld [vmem:[#allocation11 + $0x108] sm:$0xff]  ;;  %v785_v29 = vld [vmem:[#allocation12 + $0x70] sm:$0xff]  ;;  %v798_v47 = vld [vmem:[#allocation12 + $0xd8] sm:$0xff] }
  0x64   : > { %712 = vmatpush.msra.mxu3 %v650_v56  ;;  %730 = vmatpush.msrb.mxu1 %v671_v0  ;;  %v801_v31 = vld [vmem:[#allocation12 + $0xf0] sm:$0xff]  ;;  %v800_v34 = vld [vmem:[#allocation12 + $0xe8] sm:$0xff]  ;;  %v783_v50 = vld [vmem:[#allocation12 + $0x60] sm:$0xff] }
  0x65   : > { %574 = vmatpush.msra.mxu0 %v527_v25  ;;  %689 = vmatpush.msra.mxu2 %v634_v4  ;;  %v1356_v25 = vld [vmem:[%s1925_s6] ss:$0 sm:$0xff]  ;;  %v796_v49 = vld [vmem:[#allocation12 + $0xc8] sm:$0xff]  ;;  %v795_v51 = vld [vmem:[#allocation12 + $0xc0] sm:$0xff] }
  0x66   : > { %713 = vmatpush.msra.mxu3 %v649_v59  ;;  %731 = vmatpush.msrb.mxu1 %v670_v5  ;;  %v797_v48 = vld [vmem:[#allocation12 + $0xd0] sm:$0xff]  ;;  %v782_v52 = vld [vmem:[#allocation12 + $0x58] sm:$0xff]  ;;  %v780_v58 = vld [vmem:[#allocation12 + $0x48] sm:$0xff] }
  0x67   : > { %575 = vmatpush.msra.mxu0 %v526_v28  ;;  %690 = vmatpush.msra.mxu2 %v633_v7  ;;  %v802_v28 = vld [vmem:[#allocation12 + $0xf8] sm:$0xff]  ;;  %v781_v55 = vld [vmem:[#allocation12 + $0x50] sm:$0xff]  ;;  %v816_v59 = vld [vmem:[#allocation12 + $0x168] sm:$0xff] }
  0x68   : > { %1243 = vmatmul.msk.f32.gmra.mxu1 %vm490_vm0, %v525_v37  ;;  %714 = vmatpush.msra.mxu3 %v648_v62  ;;  %v818_v53 = vld [vmem:[#allocation12 + $0x178] sm:$0xff]  ;;  %v817_v56 = vld [vmem:[#allocation12 + $0x170] sm:$0xff]  ;;  %v792_v60 = vld [vmem:[#allocation12 + $0xa8] sm:$0xff] }
  0x69   : > { %732 = vmatpush.msrb.mxu1 %v669_v8  ;;  %691 = vmatpush.msra.mxu2 %v632_v10  ;;  %v794_v54 = vld [vmem:[#allocation12 + $0xb8] sm:$0xff]  ;;  %v793_v57 = vld [vmem:[#allocation12 + $0xb0] sm:$0xff]  ;;  %v779_v61 = vld [vmem:[#allocation12 + $0x40] sm:$0xff] }
  0x6a   : > { %715 = vmatpush.msra.mxu3 %v647_v3  ;;  %823 = vmatpush.msrb.mxu0 %v786_v27  ;;  %v815_v62 = vld [vmem:[#allocation12 + $0x160] sm:$0xff]  ;;  %v778_v0 = vld [vmem:[#allocation12 + $0x38] sm:$0xff]  ;;  %v777_v5 = vld [vmem:[#allocation12 + $0x30] sm:$0xff] }
  0x6b   : > { %733 = vmatpush.msrb.mxu1 %v668_v11  ;;  %692 = vmatpush.msra.mxu2 %v631_v13  ;;  %v791_v63 = vld [vmem:[#allocation12 + $0xa0] sm:$0xff]  ;;  %v814_v3 = vld [vmem:[#allocation12 + $0x158] sm:$0xff]  ;;  %v789_v7 = vld [vmem:[#allocation12 + $0x90] sm:$0xff] }
  0x6c   : > { %716 = vmatpush.msra.mxu3 %v646_v6  ;;  %824 = vmatpush.msrb.mxu0 %v785_v29  ;;  %v790_v4 = vld [vmem:[#allocation12 + $0x98] sm:$0xff]  ;;  %v813_v6 = vld [vmem:[#allocation12 + $0x150] sm:$0xff]  ;;  %v776_v8 = vld [vmem:[#allocation12 + $0x28] sm:$0xff] }
  0x6d   : > { %734 = vmatpush.msrb.mxu1 %v667_v14  ;;  %693 = vmatpush.msra.mxu2 %v630_v15  ;;  %v788_v10 = vld [vmem:[#allocation12 + $0x88] sm:$0xff]  ;;  %v775_v11 = vld [vmem:[#allocation12 + $0x20] sm:$0xff]  ;;  %v774_v14 = vld [vmem:[#allocation12 + $0x18] sm:$0xff] }
  0x6e   : > { %717 = vmatpush.msra.mxu3 %v645_v9  ;;  %825 = vmatpush.msrb.mxu0 %v784_v33  ;;  %v812_v9 = vld [vmem:[#allocation12 + $0x148] sm:$0xff]  ;;  %v787_v13 = vld [vmem:[#allocation12 + $0x80] sm:$0xff]  ;;  %v810_v15 = vld [vmem:[#allocation12 + $0x138] sm:$0xff] }
  0x6f   : > { %735 = vmatpush.msrb.mxu1 %v666_v16  ;;  %694 = vmatpush.msra.mxu2 %v629_v17  ;;  %v773_v16 = vld [vmem:[#allocation12 + $0x10] sm:$0xff] }
  0x70   : > { %718 = vmatpush.msra.mxu3 %v644_v12  ;;  %826 = vmatpush.msrb.mxu0 %v783_v50  ;;  %v811_v12 = vld [vmem:[#allocation12 + $0x140] sm:$0xff]  ;;  %v809_v17 = vld [vmem:[#allocation12 + $0x130] sm:$0xff]  ;;  %v941_v50 = vld [vmem:[#allocation14 + $0xd8] sm:$0xff] }
  0x71   : > { %736 = vmatpush.msrb.mxu1 %v665_v18  ;;  %695 = vmatpush.msra.mxu2 %v628_v19  ;;  %v772_v18 = vld [vmem:[#allocation12 + $0x8] sm:$0xff] }
  0x72   : > { %827 = vmatpush.msrb.mxu0 %v782_v52  ;;  %869 = vmatpush.msrb.mxu3 %v818_v53  ;;  %v808_v19 = vld [vmem:[#allocation12 + $0x128] sm:$0xff]  ;;  %v940_v52 = vld [vmem:[#allocation14 + $0xd0] sm:$0xff] }
  0x73   : > { %737 = vmatpush.msrb.mxu1 %v664_v20  ;;  %846 = vmatpush.msrb.mxu2 %v802_v28  ;;  %v771_v20 = vld [vmem:[#allocation12] sm:$0xff]  ;;  %v927_v53 = vld [vmem:[#allocation14 + $0x68] sm:$0xff] }
  0x74   : > { %828 = vmatpush.msrb.mxu0 %v781_v55  ;;  %870 = vmatpush.msrb.mxu3 %v817_v56  ;;  %v926_v55 = vld [vmem:[#allocation14 + $0x60] sm:$0xff] }
  0x75   : > { %738 = vmatpush.msrb.mxu1 %v663_v21  ;;  %847 = vmatpush.msrb.mxu2 %v801_v31  ;;  %v807_v21 = vld [vmem:[#allocation12 + $0x120] sm:$0xff] }
  0x76   : > { %829 = vmatpush.msrb.mxu0 %v780_v58  ;;  %871 = vmatpush.msrb.mxu3 %v816_v59  ;;  %v938_v56 = vld [vmem:[#allocation14 + $0xc0] sm:$0xff]  ;;  %v961_v58 = vld [vmem:[#allocation14 + $0x178] sm:$0xff] }
  0x77   : > { %739 = vmatpush.msrb.mxu1 %v662_v22  ;;  %848 = vmatpush.msrb.mxu2 %v800_v34  ;;  %v806_v22 = vld [vmem:[#allocation12 + $0x118] sm:$0xff] }
  0x78   : > { %830 = vmatpush.msrb.mxu0 %v779_v61  ;;  %872 = vmatpush.msrb.mxu3 %v815_v62  ;;  %v937_v59 = vld [vmem:[#allocation14 + $0xb8] sm:$0xff]  ;;  %v960_v61 = vld [vmem:[#allocation14 + $0x170] sm:$0xff] }
  0x79   : > { %740 = vmatpush.msrb.mxu1 %v661_v23  ;;  %v805_v23 = vld [vmem:[#allocation12 + $0x110] sm:$0xff] }
  0x7a   : > { %831 = vmatpush.msrb.mxu0 %v778_v0  ;;  %873 = vmatpush.msrb.mxu3 %v814_v3  ;;  %v936_v62 = vld [vmem:[#allocation14 + $0xb0] sm:$0xff]  ;;  %v959_v0 = vld [vmem:[#allocation14 + $0x168] sm:$0xff] }
  0x7b   : > { %741 = vmatpush.msrb.mxu1 %v660_v24  ;;  %v804_v24 = vld [vmem:[#allocation12 + $0x108] sm:$0xff] }
  0x7c   : > { %832 = vmatpush.msrb.mxu0 %v777_v5  ;;  %874 = vmatpush.msrb.mxu3 %v813_v6  ;;  %v935_v3 = vld [vmem:[#allocation14 + $0xa8] sm:$0xff]  ;;  %v958_v5 = vld [vmem:[#allocation14 + $0x160] sm:$0xff] }
  0x7d   : > { %v934_v6 = vld [vmem:[#allocation14 + $0xa0] sm:$0xff] }
  0x7e   : > { %833 = vmatpush.msrb.mxu0 %v776_v8  ;;  %875 = vmatpush.msrb.mxu3 %v812_v9  ;;  %v957_v8 = vld [vmem:[#allocation14 + $0x158] sm:$0xff] }
  0x7f   : > { %v933_v9 = vld [vmem:[#allocation14 + $0x98] sm:$0xff] }
  0x80   : > { %834 = vmatpush.msrb.mxu0 %v775_v11  ;;  %876 = vmatpush.msrb.mxu3 %v811_v12  ;;  %v956_v11 = vld [vmem:[#allocation14 + $0x150] sm:$0xff] }
  0x81   : > { %v932_v12 = vld [vmem:[#allocation14 + $0x90] sm:$0xff] }
  0x82   : > { %835 = vmatpush.msrb.mxu0 %v774_v14  ;;  %877 = vmatpush.msrb.mxu3 %v810_v15  ;;  %v955_v14 = vld [vmem:[#allocation14 + $0x148] sm:$0xff] }
  0x83   : > { %v931_v15 = vld [vmem:[#allocation14 + $0x88] sm:$0xff] }
  0x84   : > { %836 = vmatpush.msrb.mxu0 %v773_v16  ;;  %878 = vmatpush.msrb.mxu3 %v809_v17  ;;  %v918_v16 = vld [vmem:[#allocation14 + $0x20] sm:$0xff] }
  0x85   : > { %v954_v17 = vld [vmem:[#allocation14 + $0x140] sm:$0xff] }
  0x86   : > { %837 = vmatpush.msrb.mxu0 %v772_v18  ;;  %879 = vmatpush.msrb.mxu3 %v808_v19  ;;  %v930_v18 = vld [vmem:[#allocation14 + $0x80] sm:$0xff]  ;;  %v1046_v19 = vld [vmem:[#allocation15 + $0x38] sm:$0xff] }
  0x88   : > { %838 = vmatpush.msrb.mxu0 %v771_v20  ;;  %880 = vmatpush.msrb.mxu3 %v807_v21  ;;  %v917_v20 = vld [vmem:[#allocation14 + $0x18] sm:$0xff] }
  0x89   : > { %v953_v21 = vld [vmem:[#allocation14 + $0x138] sm:$0xff] }
  0x8a   : > { %881 = vmatpush.msrb.mxu3 %v806_v22  ;;  %v1045_v22 = vld [vmem:[#allocation15 + $0x30] sm:$0xff] }
  0x8c   : > { %882 = vmatpush.msrb.mxu3 %v805_v23  ;;  %v916_v23 = vld [vmem:[#allocation14 + $0x10] sm:$0xff] }
  0x8e   : > { %883 = vmatpush.msrb.mxu3 %v804_v24  ;;  %v952_v24 = vld [vmem:[#allocation14 + $0x130] sm:$0xff] }
  0xc8   : > { %v510_v43 = vpop.permute.xlu0 %509 }
  0xc9   : > { %516 = vst.msk [vmem:[#allocation5] sm:$0xff] %vm515_vm1, %v510_v43 }
  0xd0   : > { %v512_v44 = vpop.permute.xlu0 %511  ;;  %v522_v45 = vld [vmem:[#allocation5] sm:$0xff] }
  0xd1   : > { %517 = vst.msk [vmem:[#allocation5 + $0x18] sm:$0xff] %vm515_vm1, %v512_v44  ;;  %576 = vmatmul.f32.vlgmr.msra.gmra.mxu0 %v522_v45 }
  0xd8   : > { %v524_v46 = vld [vmem:[#allocation5 + $0x18] sm:$0xff] }
  0xd9   : > { %579 = vmatmul.f32.gmra.mxu0 %v524_v46  ;;  %v799_v46 = vld [vmem:[#allocation12 + $0xe0] sm:$0xff] }
  0xda   : > { %849 = vmatpush.msrb.mxu2 %v799_v46  ;;  %v944_v46 = vld [vmem:[#allocation14 + $0xf0] sm:$0xff] }
  0xdc   : > { %850 = vmatpush.msrb.mxu2 %v798_v47  ;;  %v943_v47 = vld [vmem:[#allocation14 + $0xe8] sm:$0xff] }
  0xdd   : > { %v600_v26 = vpop.f32.mrf.mxu1 }
  0xde   : > { %851 = vmatpush.msrb.mxu2 %v797_v48  ;;  %v942_v48 = vld [vmem:[#allocation14 + $0xe0] sm:$0xff] }
  0xe0   : > { %852 = vmatpush.msrb.mxu2 %v796_v49  ;;  %v929_v49 = vld [vmem:[#allocation14 + $0x78] sm:$0xff] }
  0xe1   : > { %966 = vmatpush.msra.mxu1 %v929_v49 }
  0xe2   : > { %853 = vmatpush.msrb.mxu2 %v795_v51  ;;  %v928_v51 = vld [vmem:[#allocation14 + $0x70] sm:$0xff] }
  0xe3   : > { %967 = vmatpush.msra.mxu1 %v928_v51 }
  0xe4   : > { %854 = vmatpush.msrb.mxu2 %v794_v54  ;;  %v939_v54 = vld [vmem:[#allocation14 + $0xc8] sm:$0xff] }
  0xe5   : > { %v603_v38 = vpop.f32.mrf.mxu1  ;;  %968 = vmatpush.msra.mxu1 %v927_v53 }
  0xe6   : > { %855 = vmatpush.msrb.mxu2 %v793_v57  ;;  %v925_v57 = vld [vmem:[#allocation14 + $0x58] sm:$0xff] }
  0xe7   : > { %969 = vmatpush.msra.mxu1 %v926_v55 }
  0xe8   : > { %856 = vmatpush.msrb.mxu2 %v792_v60  ;;  %v924_v60 = vld [vmem:[#allocation14 + $0x50] sm:$0xff] }
  0xe9   : > { %970 = vmatpush.msra.mxu1 %v925_v57  ;;  %v1359_v57 = vld [vmem:[%s1928_s9] ss:$0 sm:$0xff] }
  0xea   : > { %857 = vmatpush.msrb.mxu2 %v791_v63  ;;  %v923_v63 = vld [vmem:[#allocation14 + $0x48] sm:$0xff] }
  0xeb   : > { %971 = vmatpush.msra.mxu1 %v924_v60 }
  0xec   : > { %858 = vmatpush.msrb.mxu2 %v790_v4  ;;  %v922_v4 = vld [vmem:[#allocation14 + $0x40] sm:$0xff] }
  0xed   : > { %972 = vmatpush.msra.mxu1 %v923_v63 }
  0xee   : > { %859 = vmatpush.msrb.mxu2 %v789_v7  ;;  %v921_v7 = vld [vmem:[#allocation14 + $0x38] sm:$0xff] }
  0xef   : > { %973 = vmatpush.msra.mxu1 %v922_v4 }
  0xf0   : > { %860 = vmatpush.msrb.mxu2 %v788_v10  ;;  %v920_v10 = vld [vmem:[#allocation14 + $0x30] sm:$0xff] }
  0xf1   : > { %974 = vmatpush.msra.mxu1 %v921_v7 }
  0xf2   : > { %861 = vmatpush.msrb.mxu2 %v787_v13  ;;  %v919_v13 = vld [vmem:[#allocation14 + $0x28] sm:$0xff] }
  0xf3   : > { %975 = vmatpush.msra.mxu1 %v920_v10 }
  0xf5   : > { %976 = vmatpush.msra.mxu1 %v919_v13 }
  0xf7   : > { %977 = vmatpush.msra.mxu1 %v918_v16 }
  0xf9   : > { %978 = vmatpush.msra.mxu1 %v917_v20 }
  0xfb   : > { %979 = vmatpush.msra.mxu1 %v916_v23 }
 0x14e   : > { %v577_v30 = vpop.f32.mrf.mxu0 }
 0x14f   : > { %v578_v32 = vadd.f32 %v1356_v25, %v577_v30 }
 0x151   : > { %v601_v35 = vadd.f32 %v600_v26, %v578_v32  ;;  %v1357_v26 = vld [vmem:[%s1926_s7] ss:$0 sm:$0xff] }
 0x153   : > { %v606_v36 = vmax.f32 %v601_v35, 0.0 }
 0x155   : > { %608 = vst [vmem:[#allocation3 + $0x8] sm:$0xff] %v606_v36  ;;  %719 = vmatmul.f32.vlgmr.msra.gmra.mxu3 %v606_v36 }
 0x156   : > { %v580_v37 = vpop.f32.mrf.mxu0 }
 0x157   : > { %v581_v39 = vadd.f32 %v1356_v25, %v580_v37  ;;  %v803_v25 = vld [vmem:[#allocation12 + $0x100] sm:$0xff] }
 0x158   : > { %884 = vmatpush.msrb.mxu3 %v803_v25  ;;  %v1044_v25 = vld [vmem:[#allocation15 + $0x28] sm:$0xff] }
 0x159   : > { %v604_v40 = vadd.f32 %v603_v38, %v581_v39 }
 0x15a   : > { %1065 = vmatpush.msra.mxu3 %v1046_v19 }
 0x15b   : > { %v607_v41 = vmax.f32 %v604_v40, 0.0 }
 0x15c   : > { %v610_v42 = vld [vmem:[#allocation3 + $0x7] sm:$0xff]  ;;  %1066 = vmatpush.msra.mxu3 %v1045_v22 }
 0x15d   : > { %609 = vst [vmem:[#allocation3 + $0x10] sm:$0xff] %v607_v41  ;;  %696 = vmatmul.f32.vlgmr.msra.gmra.mxu2 %v610_v42  ;;  %722 = vmatmul.f32.gmra.mxu3 %v607_v41 }
 0x15e   : > { %1012 = vmatpush.msra.mxu2 %v961_v58  ;;  %1067 = vmatpush.msra.mxu3 %v1044_v25 }
 0x160   : > { %1013 = vmatpush.msra.mxu2 %v960_v61 }
 0x162   : > { %1014 = vmatpush.msra.mxu2 %v959_v0 }
 0x164   : > { %v611_v43 = vld [vmem:[#allocation3 + $0xf] sm:$0xff]  ;;  %1015 = vmatpush.msra.mxu2 %v958_v5 }
 0x165   : > { %v618_v44 = vld [vmem:[#allocation3 + $0x9] sm:$0xff]  ;;  %699 = vmatmul.f32.gmra.mxu2 %v611_v43  ;;  %v619_v45 = vld [vmem:[#allocation3 + $0x11] sm:$0xff] }
 0x166   : > { %742 = vmatmul.f32.vlgmr.msrb.gmra.mxu1 %v618_v44  ;;  %1016 = vmatpush.msra.mxu2 %v957_v8 }
 0x168   : > { %1017 = vmatpush.msra.mxu2 %v956_v11 }
 0x16a   : > { %1018 = vmatpush.msra.mxu2 %v955_v14 }
 0x16c   : > { %1019 = vmatpush.msra.mxu2 %v954_v17 }
 0x16e   : > { %745 = vmatmul.f32.gmra.mxu1 %v619_v45  ;;  %v945_v45 = vld [vmem:[#allocation14 + $0xf8] sm:$0xff]  ;;  %1020 = vmatpush.msra.mxu2 %v953_v21 }
 0x16f   : > { %989 = vmatpush.msra.mxu0 %v945_v45 }
 0x170   : > { %1021 = vmatpush.msra.mxu2 %v952_v24 }
 0x171   : > { %990 = vmatpush.msra.mxu0 %v944_v46 }
 0x173   : > { %991 = vmatpush.msra.mxu0 %v943_v47 }
 0x175   : > { %992 = vmatpush.msra.mxu0 %v942_v48 }
 0x177   : > { %993 = vmatpush.msra.mxu0 %v941_v50 }
 0x179   : > { %994 = vmatpush.msra.mxu0 %v940_v52 }
 0x17b   : > { %995 = vmatpush.msra.mxu0 %v939_v54 }
 0x17d   : > { %996 = vmatpush.msra.mxu0 %v938_v56 }
 0x17f   : > { %997 = vmatpush.msra.mxu0 %v937_v59  ;;  %v1360_v59 = vld [vmem:[%s1929_s10] ss:$0 sm:$0xff] }
 0x181   : > { %998 = vmatpush.msra.mxu0 %v936_v62 }
 0x183   : > { %999 = vmatpush.msra.mxu0 %v935_v3 }
 0x185   : > { %1000 = vmatpush.msra.mxu0 %v934_v6 }
 0x187   : > { %1001 = vmatpush.msra.mxu0 %v933_v9 }
 0x189   : > { %1002 = vmatpush.msra.mxu0 %v932_v12 }
 0x18b   : > { %1003 = vmatpush.msra.mxu0 %v931_v15 }
 0x18d   : > { %1004 = vmatpush.msra.mxu0 %v930_v18 }
 0x1d8   : > { %v720_v28 = vpop.f32.mrf.mxu3 }
 0x1e0   : > { %v697_v27 = vpop.f32.mrf.mxu2  ;;  %v723_v36 = vpop.f32.mrf.mxu3 }
 0x1e1   : > { %v698_v29 = vadd.f32 %v1357_v26, %v697_v27  ;;  %v951_v27 = vld [vmem:[#allocation14 + $0x128] sm:$0xff] }
 0x1e2   : > { %1022 = vmatpush.msra.mxu2 %v951_v27 }
 0x1e3   : > { %v743_v30 = vpop.f32.mrf.mxu1  ;;  %v721_v31 = vadd.f32 %v720_v28, %v698_v29  ;;  %v1043_v28 = vld [vmem:[#allocation15 + $0x20] sm:$0xff] }
 0x1e4   : > { %v914_v29 = vld [vmem:[#allocation14] sm:$0xff]  ;;  %1068 = vmatpush.msra.mxu3 %v1043_v28 }
 0x1e5   : > { %v744_v32 = vadd.f32 %v743_v30, %v721_v31  ;;  %v950_v30 = vld [vmem:[#allocation14 + $0x120] sm:$0xff]  ;;  %v1042_v31 = vld [vmem:[#allocation15 + $0x18] sm:$0xff] }
 0x1e6   : > { %1023 = vmatpush.msra.mxu2 %v950_v30  ;;  %1069 = vmatpush.msra.mxu3 %v1042_v31 }
 0x1e7   : > { %v749_v33 = vmax.f32 %v744_v32, 0.0  ;;  %v949_v32 = vld [vmem:[#allocation14 + $0x118] sm:$0xff] }
 0x1e8   : > { %v700_v34 = vpop.f32.mrf.mxu2  ;;  %1024 = vmatpush.msra.mxu2 %v949_v32 }
 0x1e9   : > { %751 = vst [vmem:[#allocation4 + $0x8] sm:$0xff] %v749_v33  ;;  %v701_v35 = vadd.f32 %v1357_v26, %v700_v34  ;;  %862 = vmatmul.f32.vlgmr.msrb.gmra.mxu2 %v749_v33  ;;  %v915_v26 = vld [vmem:[#allocation14 + $0x8] sm:$0xff]  ;;  %v1041_v33 = vld [vmem:[#allocation15 + $0x10] sm:$0xff] }
 0x1ea   : > { %980 = vmatpush.msra.mxu1 %v915_v26  ;;  %v948_v34 = vld [vmem:[#allocation14 + $0x110] sm:$0xff]  ;;  %1070 = vmatpush.msra.mxu3 %v1041_v33 }
 0x1eb   : > { %v724_v37 = vadd.f32 %v723_v36, %v701_v35  ;;  %v746_v38 = vpop.f32.mrf.mxu1  ;;  %v1040_v35 = vld [vmem:[#allocation15 + $0x8] sm:$0xff]  ;;  %1025 = vmatpush.msra.mxu2 %v948_v34 }
 0x1ec   : > { %981 = vmatpush.msra.mxu1 %v914_v29  ;;  %v947_v36 = vld [vmem:[#allocation14 + $0x108] sm:$0xff]  ;;  %1071 = vmatpush.msra.mxu3 %v1040_v35 }
 0x1ed   : > { %v747_v39 = vadd.f32 %v746_v38, %v724_v37  ;;  %v1039_v37 = vld [vmem:[#allocation15] sm:$0xff]  ;;  %1026 = vmatpush.msra.mxu2 %v947_v36 }
 0x1ee   : > { %v946_v38 = vld [vmem:[#allocation14 + $0x100] sm:$0xff]  ;;  %1072 = vmatpush.msra.mxu3 %v1039_v37 }
 0x1ef   : > { %v750_v40 = vmax.f32 %v747_v39, 0.0  ;;  %1027 = vmatpush.msra.mxu2 %v946_v38 }
 0x1f0   : > { %v753_v41 = vld [vmem:[#allocation4 + $0x6] sm:$0xff] }
 0x1f1   : > { %752 = vst [vmem:[#allocation4 + $0x10] sm:$0xff] %v750_v40  ;;  %839 = vmatmul.f32.vlgmr.msrb.gmra.mxu0 %v753_v41  ;;  %865 = vmatmul.f32.gmra.mxu2 %v750_v40  ;;  %v1358_v40 = vld [vmem:[%s1927_s8] ss:$0 sm:$0xff] }
 0x1f8   : > { %v754_v42 = vld [vmem:[#allocation4 + $0xe] sm:$0xff] }
 0x1f9   : > { %v761_v43 = vld [vmem:[#allocation4 + $0xa] sm:$0xff]  ;;  %842 = vmatmul.f32.gmra.mxu0 %v754_v42  ;;  %v762_v44 = vld [vmem:[#allocation4 + $0x12] sm:$0xff] }
 0x1fa   : > { %885 = vmatmul.f32.vlgmr.msrb.gmra.mxu3 %v761_v43 }
 0x202   : > { %888 = vmatmul.f32.gmra.mxu3 %v762_v44 }
 0x20a   : > { %1244 = vmatmul.msk.f32.vlgmr.msra.gmra.mxu3 %vm490_vm0, %v1851_v1 }
 0x212   : > { %1245 = vmatmul.msk.f32.gmra.mxu3 %vm490_vm0, %v1853_v2 }
 0x26c   : > { %v863_v42 = vpop.f32.mrf.mxu2 }
 0x26e   : > { %v840_v39 = vpop.f32.mrf.mxu0 }
 0x26f   : > { %v841_v41 = vadd.f32 %v1358_v40, %v840_v39 }
 0x271   : > { %v864_v43 = vadd.f32 %v863_v42, %v841_v41 }
 0x274   : > { %v866_v49 = vpop.f32.mrf.mxu2 }
 0x276   : > { %v843_v44 = vpop.f32.mrf.mxu0 }
 0x277   : > { %v844_v47 = vadd.f32 %v1358_v40, %v843_v44 }
 0x279   : > { %v867_v1 = vadd.f32 %v866_v49, %v844_v47 }
 0x27d   : > { %v886_v45 = vpop.f32.mrf.mxu3 }
 0x27e   : > { %v887_v46 = vadd.f32 %v886_v45, %v864_v43 }
 0x280   : > { %v892_v48 = vmax.f32 %v887_v46, 0.0 }
 0x282   : > { %894 = vst [vmem:[#allocation3 + $0x8] sm:$0xff] %v892_v48  ;;  %1005 = vmatmul.f32.vlgmr.msra.gmra.mxu0 %v892_v48 }
 0x283   : > { %902 = vst [vmem:[#allocation5 + $0x8] sm:$0xff] %v892_v48 }
 0x285   : > { %v889_v50 = vpop.f32.mrf.mxu3 }
 0x286   : > { %v890_v51 = vadd.f32 %v889_v50, %v867_v1 }
 0x288   : > { %v893_v52 = vmax.f32 %v890_v51, 0.0 }
 0x289   : > { %v896_v53 = vld [vmem:[#allocation3 + $0x5] sm:$0xff] }
 0x28a   : > { %895 = vst [vmem:[#allocation3 + $0x10] sm:$0xff] %v893_v52  ;;  %982 = vmatmul.f32.vlgmr.msra.gmra.mxu1 %v896_v53  ;;  %1008 = vmatmul.f32.gmra.mxu0 %v893_v52 }
 0x28b   : > { %898 = vst [vmem:[#allocation5] sm:$0xff] %v896_v53 }
 0x28c   : > { %903 = vst [vmem:[#allocation5 + $0x20] sm:$0xff] %v893_v52 }
 0x28d   : > { %v1074_v58 = vpop.f32.mrf.mxu3 }
 0x28e   : > { %v1075_v62 = vadd.f32 %v1360_v59, %v1074_v58 }
 0x290   : > { %v1080_v5 = vmax.f32 %v1075_v62, 0.0 }
 0x291   : > { %v897_v2 = vld [vmem:[#allocation3 + $0xd] sm:$0xff] }
 0x292   : > { %v904_v54 = vld [vmem:[#allocation3 + $0xb] sm:$0xff]  ;;  %v905_v55 = vld [vmem:[#allocation3 + $0x13] sm:$0xff]  ;;  %899 = vst [vmem:[#allocation5 + $0x18] sm:$0xff] %v897_v2  ;;  %985 = vmatmul.f32.gmra.mxu1 %v897_v2 }
 0x293   : > { %1028 = vmatmul.f32.vlgmr.msra.gmra.mxu2 %v904_v54 }
 0x295   : > { %v1077_v6 = vpop.f32.mrf.mxu3 }
 0x296   : > { %v1078_v10 = vadd.f32 %v1360_v59, %v1077_v6 }
 0x298   : > { %v1081_v15 = vmax.f32 %v1078_v10, 0.0 }
 0x29b   : > { %1031 = vmatmul.f32.gmra.mxu2 %v905_v55 }
 0x2ff   : > { %v1006_v61 = vpop.f32.mrf.mxu0 }
 0x307   : > { %v983_v56 = vpop.f32.mrf.mxu1  ;;  %v1009_v11 = vpop.f32.mrf.mxu0 }
 0x308   : > { %v984_v60 = vadd.f32 %v1359_v57, %v983_v56 }
 0x30a   : > { %v1007_v63 = vadd.f32 %v1006_v61, %v984_v60 }
 0x30f   : > { %v986_v0 = vpop.f32.mrf.mxu1 }
 0x310   : > { %v987_v7 = vadd.f32 %v1359_v57, %v986_v0 }
 0x312   : > { %v1010_v12 = vadd.f32 %v1009_v11, %v987_v7 }
 0x316   : > { %v1029_v3 = vpop.f32.mrf.mxu2 }
 0x317   : > { %v1030_v4 = vadd.f32 %v1029_v3, %v1007_v63 }
 0x319   : > { %v1035_v8 = vmax.f32 %v1030_v4, 0.0 }
 0x31b   : > { %v1082_v9 = vadd.f32 %v1080_v5, %v1035_v8 }
 0x31d   : > { %1084 = vst [vmem:[%s489_s22] sm:$0xff] %v1082_v9 }
 0x31e   : > { %v1032_v13 = vpop.f32.mrf.mxu2 }
 0x31f   : > { %v1033_v14 = vadd.f32 %v1032_v13, %v1010_v12 }
 0x321   : > { %v1036_v16 = vmax.f32 %v1033_v14, 0.0 }
 0x323   : > { %v1083_v17 = vadd.f32 %v1081_v15, %v1036_v16 }
 0x325   : > { %1085 = vst [vmem:[%s489_s22 + $0x8] sm:$0xff] %v1083_v17 }
 0x326   : > { %1568 = shalt.err (!%p1565_p9)
}
 0x327   : > { %s1630_s29 = smov 128   ;;  %s1631_s5 = smov 8  }
 0x328   : > { %1275 = dma.vmem_to_hbm [thread:$0]  (%p1793_p13), %s1100_s26, 256, %s1102_s12, %s1087_s24, %s1630_s29, %s1630_s29, %s1631_s5  }
 0x329 PF: > { %s1116_s22 = sand.u32 1, %s1607_s17   ;;  %p1951_p10 = scmp.ge.s32.totalorder %s1619_s20, 2 }
 0x32a   : > { %s1117_s2 = scalar_lea.sflag [#allocation8], %s1116_s22 }
 0x32b   : > { %p1298_p11 = pnand %p1951_p10, %p1798_p4 }
 0x32d   : > { %p1299_p0 = pneg %p1298_p11 }
 0x32f   : > { %1602 = dma.done.wait (%p1299_p0), %s1117_s2, 256  }
 0x330   : > { %1604 = vsyncadd (%p1299_p0), %s1117_s2, 4294967040  ;;  %p27_p2 = scmp.ge.s32.totalorder %s1773_s16, 4   ;;  %s1952_s17 = smov %s1611_s18 }
 0x331   : > { %s1953_s18 = smov %s1615_s19  ;;  %s1954_s19 = smov %s1785_s13 }
 0x332   : > { %s1955_s20 = smov %s1773_s16  ;;  %29 = sbr.rel (!%p27_p2) target bundleno = 14 (0xe), region = 129 }
 0x337   :  { %1123 = vsyncpa [#allocation7], 1 }
 0x338   :  { %1125 = vsyncpa [#allocation7 + $0x1], 1 }
 0x339   :  { %1126 = vsyncpa [#allocation10], 1 }
 0x33a   :  { %1127 = vsyncpa [#allocation13], 1 }
 0x33b   :  { %1128 = vsyncpa [#allocation16], 1 }
 0x33c   :  { %1129 = vsyncpa [#allocation8], 1 }
 0x33d   :  { %1131 = vsyncpa [#allocation8 + $0x1], 1 }

</bundles_post_ra>
